<compile_context>
chip_gen: v6e
topology: v6e:2x2x1
jax: 0.10.0
libtpu: 0.0.40
codegen_flags: <defaults>
</compile_context>

<pallas_src>
import functools

import jax
import jax.numpy as jnp
from jax import lax
from jax.experimental import pallas as pl
from jax.experimental.pallas import tpu as pltpu

_LANE = 128
_SUBLANE = 8


def _round_up(x, m):
    return ((x + m - 1) // m) * m


def _seq_rnn_kernel(x2d_ref,                         # (T*Bp, E)
                    wih_ref,                         # (E, 3*Hp)  gate-major [r|z|n]
                    whh_ref,                         # (Hp, 3*Hp) gate-major [r|z|n]
                    b_cat_ref,                       # (1, 3*Hp)  [b_ir+b_hr | b_iz+b_hz | b_in]
                    b_hn_ref,                        # (1, Hp)
                    wout_ref,                        # (Hp, Op)
                    bout_ref,                        # (1, Op)
                    hs_ref,                          # out: (T*Bp, Hp)
                    pred_ref,                        # out: (T*Bp, Op)
                    gi_ref,                          # scratch: (T*Bp, 3*Hp)
                    *, seq_len, batch_pad, hidden_pad):
    T, Bp, Hp = seq_len, batch_pad, hidden_pad

    # ---- Prologue: ONE fused input-projection GEMM for all gates & steps ----
    gi_ref[...] = (jnp.dot(x2d_ref[...], wih_ref[...],
                           preferred_element_type=jnp.float32) + b_cat_ref[...])

    whh = whh_ref[...]                                # resident across all steps
    b_hn = jnp.broadcast_to(b_hn_ref[...], (Bp, Hp))  # hoisted (no per-iter broadcast)

    # ---- Serial recurrence: exactly one (Bp,Hp)@(Hp,3Hp) matmul per step ----
    def step(t, h):
        row = pl.multiple_of(t * Bp, _SUBLANE)        # Bp % 8 == 0 -> aligned slices
        sl = pl.ds(row, Bp)
        gi_t = gi_ref[sl, :]                          # (Bp, 3Hp)
        gh = jnp.dot(h, whh, preferred_element_type=jnp.float32)   # (Bp, 3Hp)
        # r|z gates: one sigmoid over 2*Hp contiguous lanes; slices are whole vregs.
        rz = jax.nn.sigmoid(gi_t[:, :2 * Hp] + gh[:, :2 * Hp])
        r = rz[:, :Hp]
        z = rz[:, Hp:]
        n = jnp.tanh(gi_t[:, 2 * Hp:] + r * (gh[:, 2 * Hp:] + b_hn))
        h_new = (1.0 - z) * n + z * h
        hs_ref[sl, :] = h_new                         # lane-dense (Hp multiple of 128)
        return h_new

    h0 = jnp.zeros((Bp, Hp), jnp.float32)             # initHidden = zeros
    lax.fori_loop(0, T, step, h0, unroll=True)

    # ---- Epilogue: Linear(relu(.)) as one lane-dense batched GEMM -----------
    hs = hs_ref[...]
    pred_ref[...] = (jnp.dot(jnp.maximum(hs, 0.0), wout_ref[...],
                             preferred_element_type=jnp.float32) + bout_ref[...])


def seq_rnn_forward(x_btE, params):
    """x_btE: (B, T, E) float32, batch-first like the PyTorch module."""
    B, T, E = x_btE.shape
    H = params["w_hh"].shape[0] // 3
    O = params["w_out"].shape[0]
    Bp = _round_up(B, _SUBLANE)                       # pad batch to 8 sublanes
    Hp = _round_up(H, _LANE)                          # lane-dense hidden width
    Op = _round_up(O, _LANE)                          # lane-dense output width

    # dropout p=0.0 -> identity.  Time-major layout, padded batch.
    x_tbE = jnp.transpose(x_btE, (1, 0, 2))           # (T, B, E)
    if Bp != B:
        x_tbE = jnp.pad(x_tbE, ((0, 0), (0, Bp - B), (0, 0)))
    x2d = x_tbE.reshape(T * Bp, E)

    w_ih, w_hh = params["w_ih"], params["w_hh"]
    b_ih, b_hh = params["b_ih"], params["b_hh"]

    # Gate-major, 128-lane-padded weight slabs (PyTorch gate order r, z, n).
    wih_cat = jnp.zeros((E, 3 * Hp), jnp.float32)
    whh_cat = jnp.zeros((Hp, 3 * Hp), jnp.float32)
    for g in range(3):
        wih_cat = wih_cat.at[:, g * Hp:g * Hp + H].set(w_ih[g * H:(g + 1) * H].T)
        whh_cat = whh_cat.at[:H, g * Hp:g * Hp + H].set(w_hh[g * H:(g + 1) * H].T)
    # Fold b_ir+b_hr and b_iz+b_hz into gi; b_hn stays inside r*( . ).
    b_cat = jnp.zeros((1, 3 * Hp), jnp.float32)
    b_cat = b_cat.at[0, 0 * Hp:0 * Hp + H].set(b_ih[0:H] + b_hh[0:H])
    b_cat = b_cat.at[0, 1 * Hp:1 * Hp + H].set(b_ih[H:2 * H] + b_hh[H:2 * H])
    b_cat = b_cat.at[0, 2 * Hp:2 * Hp + H].set(b_ih[2 * H:3 * H])
    b_hn = jnp.zeros((1, Hp), jnp.float32).at[0, :H].set(b_hh[2 * H:3 * H])

    wout_pad = jnp.zeros((Hp, Op), jnp.float32).at[:H, :O].set(params["w_out"].T)
    bout_pad = jnp.zeros((1, Op), jnp.float32).at[0, :O].set(params["b_out"])

    # Explicit scoped-VMEM budget sized from the actual slabs (with headroom),
    # clamped below the v7x physical limit.
    slab_bytes = 4 * (T * Bp * (E + 3 * Hp + Hp + Op)
                      + E * 3 * Hp + Hp * 3 * Hp + 3 * Hp + Hp + Hp * Op + Op)
    vmem_limit = int(min(max(3 * slab_bytes, 16 * 1024 * 1024), 56 * 1024 * 1024))

    vmem = pltpu.MemorySpace.VMEM
    kernel = functools.partial(_seq_rnn_kernel, seq_len=T, batch_pad=Bp, hidden_pad=Hp)

    hs2d, pred2d = pl.pallas_call(
        kernel,
        out_shape=(
            jax.ShapeDtypeStruct((T * Bp, Hp), jnp.float32),   # GRU hidden states
            jax.ShapeDtypeStruct((T * Bp, Op), jnp.float32),   # predictions
        ),
        in_specs=[pl.BlockSpec(memory_space=vmem)] * 7,
        out_specs=(pl.BlockSpec(memory_space=vmem),
                   pl.BlockSpec(memory_space=vmem)),
        scratch_shapes=[pltpu.VMEM((T * Bp, 3 * Hp), jnp.float32)],
        compiler_params=pltpu.CompilerParams(vmem_limit_bytes=vmem_limit),
    )(x2d, wih_cat, whh_cat, b_cat, b_hn, wout_pad, bout_pad)

    hs = hs2d.reshape(T, Bp, Hp)
    pred = pred2d.reshape(T, Bp, Op)
    prediction = jnp.transpose(pred[:, :B, :O], (1, 0, 2))     # (B, T, O) batch-first
    hidden = hs[-1, :B, :H][None, :, :]                        # (num_layers=1, B, H)
    return prediction, hidden


def init_params(key, embed_dim, hidden_size, outputs):
    """Deterministic init matching the PyTorch parameter shapes."""
    k = jax.random.split(key, 6)
    bound = 1.0 / jnp.sqrt(hidden_size)
    u = lambda kk, shape: jax.random.uniform(kk, shape, jnp.float32, -bound, bound)
    return {
        "w_ih": u(k[0], (3 * hidden_size, embed_dim)),
        "w_hh": u(k[1], (3 * hidden_size, hidden_size)),
        "b_ih": u(k[2], (3 * hidden_size,)),
        "b_hh": u(k[3], (3 * hidden_size,)),
        "w_out": u(k[4], (outputs, hidden_size)),
        "b_out": u(k[5], (outputs,)),
    }


def _reference_forward(x_btE, params):
    """Pure-JAX GRU reference (PyTorch equations) for validation."""
    H = params["w_hh"].shape[0] // 3
    w_ih_t, w_hh_t = params["w_ih"].T, params["w_hh"].T
    b_ih, b_hh = params["b_ih"], params["b_hh"]

    def step(h, x_t):
        gi = x_t @ w_ih_t + b_ih
        gh = h @ w_hh_t + b_hh
        i_r, i_z, i_n = gi[:, :H], gi[:, H:2 * H], gi[:, 2 * H:]
        h_r, h_z, h_n = gh[:, :H], gh[:, H:2 * H], gh[:, 2 * H:]
        r = jax.nn.sigmoid(i_r + h_r)
        z = jax.nn.sigmoid(i_z + h_z)
        n = jnp.tanh(i_n + r * h_n)
        h_new = (1.0 - z) * n + z * h
        return h_new, h_new

    B = x_btE.shape[0]
    h0 = jnp.zeros((B, H), jnp.float32)
    h_last, outs = jax.lax.scan(step, h0, jnp.transpose(x_btE, (1, 0, 2)))
    outs = jnp.transpose(outs, (1, 0, 2))                      # (B, T, H)
    pred = jnp.maximum(outs, 0.0) @ params["w_out"].T + params["b_out"]
    return pred, h_last[None]


if __name__ == "__main__":
    B, T, E, H, O = 4, 8, 16, 32, 2   # batch, seq, embed_dim, hidden_size, outputs

    key = jax.random.PRNGKey(0)
    kx, kp = jax.random.split(key)
    x = jax.random.normal(kx, (B, T, E), jnp.float32)
    params = init_params(kp, E, H, O)

    pred, hidden = jax.jit(seq_rnn_forward)(x, params)
    jax.block_until_ready((pred, hidden))

    pred_ref, hidden_ref = _reference_forward(x, params)
    assert pred.shape == (B, T, O) and hidden.shape == (1, B, H)
    assert jnp.allclose(pred, pred_ref, atol=1e-4, rtol=1e-4), \
        float(jnp.max(jnp.abs(pred - pred_ref)))
    assert jnp.allclose(hidden, hidden_ref, atol=1e-4, rtol=1e-4), \
        float(jnp.max(jnp.abs(hidden - hidden_ref)))

    print("KERNEL_OK")
</pallas_src>

<mosaic_0001>
module attributes {stable_mosaic.version = 11 : i64} {
  func.func @_seq_rnn_kernel(%arg0: memref<64x16xf32, #tpu.memory_space<vmem>>, %arg1: memref<16x384xf32, #tpu.memory_space<vmem>>, %arg2: memref<128x384xf32, #tpu.memory_space<vmem>>, %arg3: memref<1x384xf32, #tpu.memory_space<vmem>>, %arg4: memref<1x128xf32, #tpu.memory_space<vmem>>, %arg5: memref<128x128xf32, #tpu.memory_space<vmem>>, %arg6: memref<1x128xf32, #tpu.memory_space<vmem>>, %arg7: memref<64x128xf32, #tpu.memory_space<vmem>>, %arg8: memref<64x128xf32, #tpu.memory_space<vmem>>, %arg9: memref<64x384xf32, #tpu.memory_space<vmem>>) attributes {dimension_semantics = [], scalar_prefetch = 0 : i64, scratch_operands = 1 : i64, tpu.core_type = #tpu.core_type<tc>} {
    %c0 = arith.constant 0 : index
    %c0_0 = arith.constant 0 : index
    %0 = vector.load %arg0[%c0, %c0_0] : memref<64x16xf32, #tpu.memory_space<vmem>>, vector<64x16xf32>
    %c0_1 = arith.constant 0 : index
    %c0_2 = arith.constant 0 : index
    %1 = vector.load %arg1[%c0_1, %c0_2] : memref<16x384xf32, #tpu.memory_space<vmem>>, vector<16x384xf32>
    %cst = arith.constant dense<0.000000e+00> : vector<64x384xf32>
    %2 = tpu.matmul %0, %1, %cst {dimension_numbers = #tpu.dot_dimension_numbers<[1], [0], [0], [1], [0, 0, 1, 1], [], []>} : vector<64x16xf32>, vector<16x384xf32>, vector<64x384xf32> -> vector<64x384xf32>
    %c0_3 = arith.constant 0 : index
    %c0_4 = arith.constant 0 : index
    %3 = vector.load %arg3[%c0_3, %c0_4] : memref<1x384xf32, #tpu.memory_space<vmem>>, vector<1x384xf32>
    %4 = vector.broadcast %3 : vector<1x384xf32> to vector<64x384xf32>
    %5 = arith.addf %2, %4 : vector<64x384xf32>
    %c0_5 = arith.constant 0 : index
    %c0_6 = arith.constant 0 : index
    %6 = vector.load %arg9[%c0_5, %c0_6] : memref<64x384xf32, #tpu.memory_space<vmem>>, vector<64x384xf32>
    tpu.vector_store %arg9[%c0_5, %c0_6], %5 {strides = array<i32>} : memref<64x384xf32, #tpu.memory_space<vmem>>, vector<64x384xf32>,
    %c0_7 = arith.constant 0 : index
    %c0_8 = arith.constant 0 : index
    %7 = vector.load %arg2[%c0_7, %c0_8] : memref<128x384xf32, #tpu.memory_space<vmem>>, vector<128x384xf32>
    %c0_9 = arith.constant 0 : index
    %c0_10 = arith.constant 0 : index
    %8 = vector.load %arg4[%c0_9, %c0_10] : memref<1x128xf32, #tpu.memory_space<vmem>>, vector<1x128xf32>
    %9 = vector.shape_cast %8 : vector<1x128xf32> to vector<1x128xf32>
    %10 = vector.broadcast %9 : vector<1x128xf32> to vector<8x128xf32>
    %cst_11 = arith.constant 0.000000e+00 : f32
    %11 = vector.broadcast %cst_11 : f32 to vector<8x128xf32>
    %c0_i32 = arith.constant 0 : i32
    %c8_i32 = arith.constant 8 : i32
    %12 = arith.muli %c0_i32, %c8_i32 : i32
    %13 = tpu.assume_multiple %12, 8 : i32
    %14 = arith.index_cast %13 : i32 to index
    %c0_12 = arith.constant 0 : index
    %15 = vector.load %arg9[%14, %c0_12] : memref<64x384xf32, #tpu.memory_space<vmem>>, vector<8x384xf32>
    %cst_13 = arith.constant dense<0.000000e+00> : vector<8x384xf32>
    %16 = tpu.matmul %11, %7, %cst_13 {dimension_numbers = #tpu.dot_dimension_numbers<[1], [0], [0], [1], [0, 0, 1, 1], [], []>} : vector<8x128xf32>, vector<128x384xf32>, vector<8x384xf32> -> vector<8x384xf32>
    %17 = vector.extract_strided_slice %15 {offsets = [0, 0], sizes = [8, 256], strides = [1, 1]} : vector<8x384xf32> to vector<8x256xf32>
    %18 = vector.extract_strided_slice %16 {offsets = [0, 0], sizes = [8, 256], strides = [1, 1]} : vector<8x384xf32> to vector<8x256xf32>
    %19 = arith.addf %17, %18 : vector<8x256xf32>
    %20 = arith.negf %19 : vector<8x256xf32>
    %21 = math.exp %20 : vector<8x256xf32>
    %cst_14 = arith.constant 1.000000e+00 : f32
    %22 = vector.broadcast %cst_14 : f32 to vector<8x256xf32>
    %23 = arith.addf %22, %21 : vector<8x256xf32>
    %24 = arith.divf %22, %23 : vector<8x256xf32>
    %25 = vector.extract_strided_slice %24 {offsets = [0, 0], sizes = [8, 128], strides = [1, 1]} : vector<8x256xf32> to vector<8x128xf32>
    %26 = vector.extract_strided_slice %24 {offsets = [0, 128], sizes = [8, 128], strides = [1, 1]} : vector<8x256xf32> to vector<8x128xf32>
    %27 = vector.extract_strided_slice %15 {offsets = [0, 256], sizes = [8, 128], strides = [1, 1]} : vector<8x384xf32> to vector<8x128xf32>
    %28 = vector.extract_strided_slice %16 {offsets = [0, 256], sizes = [8, 128], strides = [1, 1]} : vector<8x384xf32> to vector<8x128xf32>
    %29 = arith.addf %28, %10 : vector<8x128xf32>
    %30 = arith.mulf %25, %29 : vector<8x128xf32>
    %31 = arith.addf %27, %30 : vector<8x128xf32>
    %32 = math.tanh %31 : vector<8x128xf32>
    %cst_15 = arith.constant 1.000000e+00 : f32
    %33 = vector.broadcast %cst_15 : f32 to vector<8x128xf32>
    %34 = arith.subf %33, %26 : vector<8x128xf32>
    %35 = arith.mulf %34, %32 : vector<8x128xf32>
    %36 = arith.mulf %26, %11 : vector<8x128xf32>
    %37 = arith.addf %35, %36 : vector<8x128xf32>
    %38 = arith.index_cast %13 : i32 to index
    %c0_16 = arith.constant 0 : index
    %39 = vector.load %arg7[%38, %c0_16] : memref<64x128xf32, #tpu.memory_space<vmem>>, vector<8x128xf32>
    tpu.vector_store %arg7[%38, %c0_16], %37 {strides = array<i32>} : memref<64x128xf32, #tpu.memory_space<vmem>>, vector<8x128xf32>,
    %c1_i32 = arith.constant 1 : i32
    %c8_i32_17 = arith.constant 8 : i32
    %40 = arith.muli %c1_i32, %c8_i32_17 : i32
    %41 = tpu.assume_multiple %40, 8 : i32
    %42 = arith.index_cast %41 : i32 to index
    %c0_18 = arith.constant 0 : index
    %43 = vector.load %arg9[%42, %c0_18] : memref<64x384xf32, #tpu.memory_space<vmem>>, vector<8x384xf32>
    %cst_19 = arith.constant dense<0.000000e+00> : vector<8x384xf32>
    %44 = tpu.matmul %37, %7, %cst_19 {dimension_numbers = #tpu.dot_dimension_numbers<[1], [0], [0], [1], [0, 0, 1, 1], [], []>} : vector<8x128xf32>, vector<128x384xf32>, vector<8x384xf32> -> vector<8x384xf32>
    %45 = vector.extract_strided_slice %43 {offsets = [0, 0], sizes = [8, 256], strides = [1, 1]} : vector<8x384xf32> to vector<8x256xf32>
    %46 = vector.extract_strided_slice %44 {offsets = [0, 0], sizes = [8, 256], strides = [1, 1]} : vector<8x384xf32> to vector<8x256xf32>
    %47 = arith.addf %45, %46 : vector<8x256xf32>
    %48 = arith.negf %47 : vector<8x256xf32>
    %49 = math.exp %48 : vector<8x256xf32>
    %cst_20 = arith.constant 1.000000e+00 : f32
    %50 = vector.broadcast %cst_20 : f32 to vector<8x256xf32>
    %51 = arith.addf %50, %49 : vector<8x256xf32>
    %52 = arith.divf %50, %51 : vector<8x256xf32>
    %53 = vector.extract_strided_slice %52 {offsets = [0, 0], sizes = [8, 128], strides = [1, 1]} : vector<8x256xf32> to vector<8x128xf32>
    %54 = vector.extract_strided_slice %52 {offsets = [0, 128], sizes = [8, 128], strides = [1, 1]} : vector<8x256xf32> to vector<8x128xf32>
    %55 = vector.extract_strided_slice %43 {offsets = [0, 256], sizes = [8, 128], strides = [1, 1]} : vector<8x384xf32> to vector<8x128xf32>
    %56 = vector.extract_strided_slice %44 {offsets = [0, 256], sizes = [8, 128], strides = [1, 1]} : vector<8x384xf32> to vector<8x128xf32>
    %57 = arith.addf %56, %10 : vector<8x128xf32>
    %58 = arith.mulf %53, %57 : vector<8x128xf32>
    %59 = arith.addf %55, %58 : vector<8x128xf32>
    %60 = math.tanh %59 : vector<8x128xf32>
    %cst_21 = arith.constant 1.000000e+00 : f32
    %61 = vector.broadcast %cst_21 : f32 to vector<8x128xf32>
    %62 = arith.subf %61, %54 : vector<8x128xf32>
    %63 = arith.mulf %62, %60 : vector<8x128xf32>
    %64 = arith.mulf %54, %37 : vector<8x128xf32>
    %65 = arith.addf %63, %64 : vector<8x128xf32>
    %66 = arith.index_cast %41 : i32 to index
    %c0_22 = arith.constant 0 : index
    %67 = vector.load %arg7[%66, %c0_22] : memref<64x128xf32, #tpu.memory_space<vmem>>, vector<8x128xf32>
    tpu.vector_store %arg7[%66, %c0_22], %65 {strides = array<i32>} : memref<64x128xf32, #tpu.memory_space<vmem>>, vector<8x128xf32>,
    %c2_i32 = arith.constant 2 : i32
    %c8_i32_23 = arith.constant 8 : i32
    %68 = arith.muli %c2_i32, %c8_i32_23 : i32
    %69 = tpu.assume_multiple %68, 8 : i32
    %70 = arith.index_cast %69 : i32 to index
    %c0_24 = arith.constant 0 : index
    %71 = vector.load %arg9[%70, %c0_24] : memref<64x384xf32, #tpu.memory_space<vmem>>, vector<8x384xf32>
    %cst_25 = arith.constant dense<0.000000e+00> : vector<8x384xf32>
    %72 = tpu.matmul %65, %7, %cst_25 {dimension_numbers = #tpu.dot_dimension_numbers<[1], [0], [0], [1], [0, 0, 1, 1], [], []>} : vector<8x128xf32>, vector<128x384xf32>, vector<8x384xf32> -> vector<8x384xf32>
    %73 = vector.extract_strided_slice %71 {offsets = [0, 0], sizes = [8, 256], strides = [1, 1]} : vector<8x384xf32> to vector<8x256xf32>
    %74 = vector.extract_strided_slice %72 {offsets = [0, 0], sizes = [8, 256], strides = [1, 1]} : vector<8x384xf32> to vector<8x256xf32>
    %75 = arith.addf %73, %74 : vector<8x256xf32>
    %76 = arith.negf %75 : vector<8x256xf32>
    %77 = math.exp %76 : vector<8x256xf32>
    %cst_26 = arith.constant 1.000000e+00 : f32
    %78 = vector.broadcast %cst_26 : f32 to vector<8x256xf32>
    %79 = arith.addf %78, %77 : vector<8x256xf32>
    %80 = arith.divf %78, %79 : vector<8x256xf32>
    %81 = vector.extract_strided_slice %80 {offsets = [0, 0], sizes = [8, 128], strides = [1, 1]} : vector<8x256xf32> to vector<8x128xf32>
    %82 = vector.extract_strided_slice %80 {offsets = [0, 128], sizes = [8, 128], strides = [1, 1]} : vector<8x256xf32> to vector<8x128xf32>
    %83 = vector.extract_strided_slice %71 {offsets = [0, 256], sizes = [8, 128], strides = [1, 1]} : vector<8x384xf32> to vector<8x128xf32>
    %84 = vector.extract_strided_slice %72 {offsets = [0, 256], sizes = [8, 128], strides = [1, 1]} : vector<8x384xf32> to vector<8x128xf32>
    %85 = arith.addf %84, %10 : vector<8x128xf32>
    %86 = arith.mulf %81, %85 : vector<8x128xf32>
    %87 = arith.addf %83, %86 : vector<8x128xf32>
    %88 = math.tanh %87 : vector<8x128xf32>
    %cst_27 = arith.constant 1.000000e+00 : f32
    %89 = vector.broadcast %cst_27 : f32 to vector<8x128xf32>
    %90 = arith.subf %89, %82 : vector<8x128xf32>
    %91 = arith.mulf %90, %88 : vector<8x128xf32>
    %92 = arith.mulf %82, %65 : vector<8x128xf32>
    %93 = arith.addf %91, %92 : vector<8x128xf32>
    %94 = arith.index_cast %69 : i32 to index
    %c0_28 = arith.constant 0 : index
    %95 = vector.load %arg7[%94, %c0_28] : memref<64x128xf32, #tpu.memory_space<vmem>>, vector<8x128xf32>
    tpu.vector_store %arg7[%94, %c0_28], %93 {strides = array<i32>} : memref<64x128xf32, #tpu.memory_space<vmem>>, vector<8x128xf32>,
    %c3_i32 = arith.constant 3 : i32
    %c8_i32_29 = arith.constant 8 : i32
    %96 = arith.muli %c3_i32, %c8_i32_29 : i32
    %97 = tpu.assume_multiple %96, 8 : i32
    %98 = arith.index_cast %97 : i32 to index
    %c0_30 = arith.constant 0 : index
    %99 = vector.load %arg9[%98, %c0_30] : memref<64x384xf32, #tpu.memory_space<vmem>>, vector<8x384xf32>
    %cst_31 = arith.constant dense<0.000000e+00> : vector<8x384xf32>
    %100 = tpu.matmul %93, %7, %cst_31 {dimension_numbers = #tpu.dot_dimension_numbers<[1], [0], [0], [1], [0, 0, 1, 1], [], []>} : vector<8x128xf32>, vector<128x384xf32>, vector<8x384xf32> -> vector<8x384xf32>
    %101 = vector.extract_strided_slice %99 {offsets = [0, 0], sizes = [8, 256], strides = [1, 1]} : vector<8x384xf32> to vector<8x256xf32>
    %102 = vector.extract_strided_slice %100 {offsets = [0, 0], sizes = [8, 256], strides = [1, 1]} : vector<8x384xf32> to vector<8x256xf32>
    %103 = arith.addf %101, %102 : vector<8x256xf32>
    %104 = arith.negf %103 : vector<8x256xf32>
    %105 = math.exp %104 : vector<8x256xf32>
    %cst_32 = arith.constant 1.000000e+00 : f32
    %106 = vector.broadcast %cst_32 : f32 to vector<8x256xf32>
    %107 = arith.addf %106, %105 : vector<8x256xf32>
    %108 = arith.divf %106, %107 : vector<8x256xf32>
    %109 = vector.extract_strided_slice %108 {offsets = [0, 0], sizes = [8, 128], strides = [1, 1]} : vector<8x256xf32> to vector<8x128xf32>
    %110 = vector.extract_strided_slice %108 {offsets = [0, 128], sizes = [8, 128], strides = [1, 1]} : vector<8x256xf32> to vector<8x128xf32>
    %111 = vector.extract_strided_slice %99 {offsets = [0, 256], sizes = [8, 128], strides = [1, 1]} : vector<8x384xf32> to vector<8x128xf32>
    %112 = vector.extract_strided_slice %100 {offsets = [0, 256], sizes = [8, 128], strides = [1, 1]} : vector<8x384xf32> to vector<8x128xf32>
    %113 = arith.addf %112, %10 : vector<8x128xf32>
    %114 = arith.mulf %109, %113 : vector<8x128xf32>
    %115 = arith.addf %111, %114 : vector<8x128xf32>
    %116 = math.tanh %115 : vector<8x128xf32>
    %cst_33 = arith.constant 1.000000e+00 : f32
    %117 = vector.broadcast %cst_33 : f32 to vector<8x128xf32>
    %118 = arith.subf %117, %110 : vector<8x128xf32>
    %119 = arith.mulf %118, %116 : vector<8x128xf32>
    %120 = arith.mulf %110, %93 : vector<8x128xf32>
    %121 = arith.addf %119, %120 : vector<8x128xf32>
    %122 = arith.index_cast %97 : i32 to index
    %c0_34 = arith.constant 0 : index
    %123 = vector.load %arg7[%122, %c0_34] : memref<64x128xf32, #tpu.memory_space<vmem>>, vector<8x128xf32>
    tpu.vector_store %arg7[%122, %c0_34], %121 {strides = array<i32>} : memref<64x128xf32, #tpu.memory_space<vmem>>, vector<8x128xf32>,
    %c4_i32 = arith.constant 4 : i32
    %c8_i32_35 = arith.constant 8 : i32
    %124 = arith.muli %c4_i32, %c8_i32_35 : i32
    %125 = tpu.assume_multiple %124, 8 : i32
    %126 = arith.index_cast %125 : i32 to index
    %c0_36 = arith.constant 0 : index
    %127 = vector.load %arg9[%126, %c0_36] : memref<64x384xf32, #tpu.memory_space<vmem>>, vector<8x384xf32>
    %cst_37 = arith.constant dense<0.000000e+00> : vector<8x384xf32>
    %128 = tpu.matmul %121, %7, %cst_37 {dimension_numbers = #tpu.dot_dimension_numbers<[1], [0], [0], [1], [0, 0, 1, 1], [], []>} : vector<8x128xf32>, vector<128x384xf32>, vector<8x384xf32> -> vector<8x384xf32>
    %129 = vector.extract_strided_slice %127 {offsets = [0, 0], sizes = [8, 256], strides = [1, 1]} : vector<8x384xf32> to vector<8x256xf32>
    %130 = vector.extract_strided_slice %128 {offsets = [0, 0], sizes = [8, 256], strides = [1, 1]} : vector<8x384xf32> to vector<8x256xf32>
    %131 = arith.addf %129, %130 : vector<8x256xf32>
    %132 = arith.negf %131 : vector<8x256xf32>
    %133 = math.exp %132 : vector<8x256xf32>
    %cst_38 = arith.constant 1.000000e+00 : f32
    %134 = vector.broadcast %cst_38 : f32 to vector<8x256xf32>
    %135 = arith.addf %134, %133 : vector<8x256xf32>
    %136 = arith.divf %134, %135 : vector<8x256xf32>
    %137 = vector.extract_strided_slice %136 {offsets = [0, 0], sizes = [8, 128], strides = [1, 1]} : vector<8x256xf32> to vector<8x128xf32>
    %138 = vector.extract_strided_slice %136 {offsets = [0, 128], sizes = [8, 128], strides = [1, 1]} : vector<8x256xf32> to vector<8x128xf32>
    %139 = vector.extract_strided_slice %127 {offsets = [0, 256], sizes = [8, 128], strides = [1, 1]} : vector<8x384xf32> to vector<8x128xf32>
    %140 = vector.extract_strided_slice %128 {offsets = [0, 256], sizes = [8, 128], strides = [1, 1]} : vector<8x384xf32> to vector<8x128xf32>
    %141 = arith.addf %140, %10 : vector<8x128xf32>
    %142 = arith.mulf %137, %141 : vector<8x128xf32>
    %143 = arith.addf %139, %142 : vector<8x128xf32>
    %144 = math.tanh %143 : vector<8x128xf32>
    %cst_39 = arith.constant 1.000000e+00 : f32
    %145 = vector.broadcast %cst_39 : f32 to vector<8x128xf32>
    %146 = arith.subf %145, %138 : vector<8x128xf32>
    %147 = arith.mulf %146, %144 : vector<8x128xf32>
    %148 = arith.mulf %138, %121 : vector<8x128xf32>
    %149 = arith.addf %147, %148 : vector<8x128xf32>
    %150 = arith.index_cast %125 : i32 to index
    %c0_40 = arith.constant 0 : index
    %151 = vector.load %arg7[%150, %c0_40] : memref<64x128xf32, #tpu.memory_space<vmem>>, vector<8x128xf32>
    tpu.vector_store %arg7[%150, %c0_40], %149 {strides = array<i32>} : memref<64x128xf32, #tpu.memory_space<vmem>>, vector<8x128xf32>,
    %c5_i32 = arith.constant 5 : i32
    %c8_i32_41 = arith.constant 8 : i32
    %152 = arith.muli %c5_i32, %c8_i32_41 : i32
    %153 = tpu.assume_multiple %152, 8 : i32
    %154 = arith.index_cast %153 : i32 to index
    %c0_42 = arith.constant 0 : index
    %155 = vector.load %arg9[%154, %c0_42] : memref<64x384xf32, #tpu.memory_space<vmem>>, vector<8x384xf32>
    %cst_43 = arith.constant dense<0.000000e+00> : vector<8x384xf32>
    %156 = tpu.matmul %149, %7, %cst_43 {dimension_numbers = #tpu.dot_dimension_numbers<[1], [0], [0], [1], [0, 0, 1, 1], [], []>} : vector<8x128xf32>, vector<128x384xf32>, vector<8x384xf32> -> vector<8x384xf32>
    %157 = vector.extract_strided_slice %155 {offsets = [0, 0], sizes = [8, 256], strides = [1, 1]} : vector<8x384xf32> to vector<8x256xf32>
    %158 = vector.extract_strided_slice %156 {offsets = [0, 0], sizes = [8, 256], strides = [1, 1]} : vector<8x384xf32> to vector<8x256xf32>
    %159 = arith.addf %157, %158 : vector<8x256xf32>
    %160 = arith.negf %159 : vector<8x256xf32>
    %161 = math.exp %160 : vector<8x256xf32>
    %cst_44 = arith.constant 1.000000e+00 : f32
    %162 = vector.broadcast %cst_44 : f32 to vector<8x256xf32>
    %163 = arith.addf %162, %161 : vector<8x256xf32>
    %164 = arith.divf %162, %163 : vector<8x256xf32>
    %165 = vector.extract_strided_slice %164 {offsets = [0, 0], sizes = [8, 128], strides = [1, 1]} : vector<8x256xf32> to vector<8x128xf32>
    %166 = vector.extract_strided_slice %164 {offsets = [0, 128], sizes = [8, 128], strides = [1, 1]} : vector<8x256xf32> to vector<8x128xf32>
    %167 = vector.extract_strided_slice %155 {offsets = [0, 256], sizes = [8, 128], strides = [1, 1]} : vector<8x384xf32> to vector<8x128xf32>
    %168 = vector.extract_strided_slice %156 {offsets = [0, 256], sizes = [8, 128], strides = [1, 1]} : vector<8x384xf32> to vector<8x128xf32>
    %169 = arith.addf %168, %10 : vector<8x128xf32>
    %170 = arith.mulf %165, %169 : vector<8x128xf32>
    %171 = arith.addf %167, %170 : vector<8x128xf32>
    %172 = math.tanh %171 : vector<8x128xf32>
    %cst_45 = arith.constant 1.000000e+00 : f32
    %173 = vector.broadcast %cst_45 : f32 to vector<8x128xf32>
    %174 = arith.subf %173, %166 : vector<8x128xf32>
    %175 = arith.mulf %174, %172 : vector<8x128xf32>
    %176 = arith.mulf %166, %149 : vector<8x128xf32>
    %177 = arith.addf %175, %176 : vector<8x128xf32>
    %178 = arith.index_cast %153 : i32 to index
    %c0_46 = arith.constant 0 : index
    %179 = vector.load %arg7[%178, %c0_46] : memref<64x128xf32, #tpu.memory_space<vmem>>, vector<8x128xf32>
    tpu.vector_store %arg7[%178, %c0_46], %177 {strides = array<i32>} : memref<64x128xf32, #tpu.memory_space<vmem>>, vector<8x128xf32>,
    %c6_i32 = arith.constant 6 : i32
    %c8_i32_47 = arith.constant 8 : i32
    %180 = arith.muli %c6_i32, %c8_i32_47 : i32
    %181 = tpu.assume_multiple %180, 8 : i32
    %182 = arith.index_cast %181 : i32 to index
    %c0_48 = arith.constant 0 : index
    %183 = vector.load %arg9[%182, %c0_48] : memref<64x384xf32, #tpu.memory_space<vmem>>, vector<8x384xf32>
    %cst_49 = arith.constant dense<0.000000e+00> : vector<8x384xf32>
    %184 = tpu.matmul %177, %7, %cst_49 {dimension_numbers = #tpu.dot_dimension_numbers<[1], [0], [0], [1], [0, 0, 1, 1], [], []>} : vector<8x128xf32>, vector<128x384xf32>, vector<8x384xf32> -> vector<8x384xf32>
    %185 = vector.extract_strided_slice %183 {offsets = [0, 0], sizes = [8, 256], strides = [1, 1]} : vector<8x384xf32> to vector<8x256xf32>
    %186 = vector.extract_strided_slice %184 {offsets = [0, 0], sizes = [8, 256], strides = [1, 1]} : vector<8x384xf32> to vector<8x256xf32>
    %187 = arith.addf %185, %186 : vector<8x256xf32>
    %188 = arith.negf %187 : vector<8x256xf32>
    %189 = math.exp %188 : vector<8x256xf32>
    %cst_50 = arith.constant 1.000000e+00 : f32
    %190 = vector.broadcast %cst_50 : f32 to vector<8x256xf32>
    %191 = arith.addf %190, %189 : vector<8x256xf32>
    %192 = arith.divf %190, %191 : vector<8x256xf32>
    %193 = vector.extract_strided_slice %192 {offsets = [0, 0], sizes = [8, 128], strides = [1, 1]} : vector<8x256xf32> to vector<8x128xf32>
    %194 = vector.extract_strided_slice %192 {offsets = [0, 128], sizes = [8, 128], strides = [1, 1]} : vector<8x256xf32> to vector<8x128xf32>
    %195 = vector.extract_strided_slice %183 {offsets = [0, 256], sizes = [8, 128], strides = [1, 1]} : vector<8x384xf32> to vector<8x128xf32>
    %196 = vector.extract_strided_slice %184 {offsets = [0, 256], sizes = [8, 128], strides = [1, 1]} : vector<8x384xf32> to vector<8x128xf32>
    %197 = arith.addf %196, %10 : vector<8x128xf32>
    %198 = arith.mulf %193, %197 : vector<8x128xf32>
    %199 = arith.addf %195, %198 : vector<8x128xf32>
    %200 = math.tanh %199 : vector<8x128xf32>
    %cst_51 = arith.constant 1.000000e+00 : f32
    %201 = vector.broadcast %cst_51 : f32 to vector<8x128xf32>
    %202 = arith.subf %201, %194 : vector<8x128xf32>
    %203 = arith.mulf %202, %200 : vector<8x128xf32>
    %204 = arith.mulf %194, %177 : vector<8x128xf32>
    %205 = arith.addf %203, %204 : vector<8x128xf32>
    %206 = arith.index_cast %181 : i32 to index
    %c0_52 = arith.constant 0 : index
    %207 = vector.load %arg7[%206, %c0_52] : memref<64x128xf32, #tpu.memory_space<vmem>>, vector<8x128xf32>
    tpu.vector_store %arg7[%206, %c0_52], %205 {strides = array<i32>} : memref<64x128xf32, #tpu.memory_space<vmem>>, vector<8x128xf32>,
    %c7_i32 = arith.constant 7 : i32
    %c8_i32_53 = arith.constant 8 : i32
    %208 = arith.muli %c7_i32, %c8_i32_53 : i32
    %209 = tpu.assume_multiple %208, 8 : i32
    %210 = arith.index_cast %209 : i32 to index
    %c0_54 = arith.constant 0 : index
    %211 = vector.load %arg9[%210, %c0_54] : memref<64x384xf32, #tpu.memory_space<vmem>>, vector<8x384xf32>
    %cst_55 = arith.constant dense<0.000000e+00> : vector<8x384xf32>
    %212 = tpu.matmul %205, %7, %cst_55 {dimension_numbers = #tpu.dot_dimension_numbers<[1], [0], [0], [1], [0, 0, 1, 1], [], []>} : vector<8x128xf32>, vector<128x384xf32>, vector<8x384xf32> -> vector<8x384xf32>
    %213 = vector.extract_strided_slice %211 {offsets = [0, 0], sizes = [8, 256], strides = [1, 1]} : vector<8x384xf32> to vector<8x256xf32>
    %214 = vector.extract_strided_slice %212 {offsets = [0, 0], sizes = [8, 256], strides = [1, 1]} : vector<8x384xf32> to vector<8x256xf32>
    %215 = arith.addf %213, %214 : vector<8x256xf32>
    %216 = arith.negf %215 : vector<8x256xf32>
    %217 = math.exp %216 : vector<8x256xf32>
    %cst_56 = arith.constant 1.000000e+00 : f32
    %218 = vector.broadcast %cst_56 : f32 to vector<8x256xf32>
    %219 = arith.addf %218, %217 : vector<8x256xf32>
    %220 = arith.divf %218, %219 : vector<8x256xf32>
    %221 = vector.extract_strided_slice %220 {offsets = [0, 0], sizes = [8, 128], strides = [1, 1]} : vector<8x256xf32> to vector<8x128xf32>
    %222 = vector.extract_strided_slice %220 {offsets = [0, 128], sizes = [8, 128], strides = [1, 1]} : vector<8x256xf32> to vector<8x128xf32>
    %223 = vector.extract_strided_slice %211 {offsets = [0, 256], sizes = [8, 128], strides = [1, 1]} : vector<8x384xf32> to vector<8x128xf32>
    %224 = vector.extract_strided_slice %212 {offsets = [0, 256], sizes = [8, 128], strides = [1, 1]} : vector<8x384xf32> to vector<8x128xf32>
    %225 = arith.addf %224, %10 : vector<8x128xf32>
    %226 = arith.mulf %221, %225 : vector<8x128xf32>
    %227 = arith.addf %223, %226 : vector<8x128xf32>
    %228 = math.tanh %227 : vector<8x128xf32>
    %cst_57 = arith.constant 1.000000e+00 : f32
    %229 = vector.broadcast %cst_57 : f32 to vector<8x128xf32>
    %230 = arith.subf %229, %222 : vector<8x128xf32>
    %231 = arith.mulf %230, %228 : vector<8x128xf32>
    %232 = arith.mulf %222, %205 : vector<8x128xf32>
    %233 = arith.addf %231, %232 : vector<8x128xf32>
    %234 = arith.index_cast %209 : i32 to index
    %c0_58 = arith.constant 0 : index
    %235 = vector.load %arg7[%234, %c0_58] : memref<64x128xf32, #tpu.memory_space<vmem>>, vector<8x128xf32>
    tpu.vector_store %arg7[%234, %c0_58], %233 {strides = array<i32>} : memref<64x128xf32, #tpu.memory_space<vmem>>, vector<8x128xf32>,
    %c8_i32_59 = arith.constant 8 : i32
    %c0_60 = arith.constant 0 : index
    %c0_61 = arith.constant 0 : index
    %236 = vector.load %arg7[%c0_60, %c0_61] : memref<64x128xf32, #tpu.memory_space<vmem>>, vector<64x128xf32>
    %cst_62 = arith.constant 0.000000e+00 : f32
    %237 = vector.broadcast %cst_62 : f32 to vector<64x128xf32>
    %238 = arith.maximumf %236, %237 : vector<64x128xf32>
    %c0_63 = arith.constant 0 : index
    %c0_64 = arith.constant 0 : index
    %239 = vector.load %arg5[%c0_63, %c0_64] : memref<128x128xf32, #tpu.memory_space<vmem>>, vector<128x128xf32>
    %cst_65 = arith.constant dense<0.000000e+00> : vector<64x128xf32>
    %240 = tpu.matmul %238, %239, %cst_65 {dimension_numbers = #tpu.dot_dimension_numbers<[1], [0], [0], [1], [0, 0, 1, 1], [], []>} : vector<64x128xf32>, vector<128x128xf32>, vector<64x128xf32> -> vector<64x128xf32>
    %c0_66 = arith.constant 0 : index
    %c0_67 = arith.constant 0 : index
    %241 = vector.load %arg6[%c0_66, %c0_67] : memref<1x128xf32, #tpu.memory_space<vmem>>, vector<1x128xf32>
    %242 = vector.broadcast %241 : vector<1x128xf32> to vector<64x128xf32>
    %243 = arith.addf %240, %242 : vector<64x128xf32>
    %c0_68 = arith.constant 0 : index
    %c0_69 = arith.constant 0 : index
    %244 = vector.load %arg8[%c0_68, %c0_69] : memref<64x128xf32, #tpu.memory_space<vmem>>, vector<64x128xf32>
    tpu.vector_store %arg8[%c0_68, %c0_69], %243 {strides = array<i32>} : memref<64x128xf32, #tpu.memory_space<vmem>>, vector<64x128xf32>,
    return
  }
}

</mosaic_0001>

<bundles_post_ra>
// kernel: seq_rnn_forward.1
= control target key start
LH: loop header
LB: loop body
LE: loop exit
PB: predicated region body
PF: predicated region fallthrough
CT: control target
= control target key end

     0   :  { %vm59_vm0 = vcmask 130048   ;;  %v4035_v3 = vmov 0.0   ;;  %vm2599_vm1 = vmmov 0   ;;  %v44_v63 = vlaneseq  ;;  %s4026_s1 = inlined_call_operand.vmem [shape: f32[16,384], index: 1, kind: input, shape index: {}]   ;;  %s4027_s0 = inlined_call_operand.vmem [shape: f32[64,16], index: 0, kind: input, shape index: {}]   ;;  %s4028_s2 = inlined_call_operand.vmem [shape: f32[128,384], index: 2, kind: input, shape index: {}]   ;;  %s4029_s3 = inlined_call_operand.vmem [shape: f32[1,384], index: 3, kind: input, shape index: {}]   ;;  %s4030_s4 = inlined_call_operand.vmem [shape: f32[1,128], index: 4, kind: input, shape index: {}]   ;;  %s4031_s7 = inlined_call_operand.vmem [shape: f32[64,128], index: 7, kind: output, shape index: {0}]   ;;  %s4032_s5 = inlined_call_operand.vmem [shape: f32[128,128], index: 5, kind: input, shape index: {}]   ;;  %s4033_s6 = inlined_call_operand.vmem [shape: f32[1,128], index: 6, kind: input, shape index: {}]   ;;  %s4034_s8 = inlined_call_operand.vmem [shape: f32[64,128], index: 8, kind: output, shape index: {1}]  }
   0x1   :  { %v41_v0 = vld [vmem:[%s4026_s1 + $0x28] sm:$0xff]  ;;  %v38_v1 = vld [vmem:[%s4026_s1 + $0x10] sm:$0xff]  ;;  %v28_v2 = vld [vmem:[%s4027_s0] sm:$0xff]  ;;  %148 = vmatprep.mubr.f32.mxu0 %v4035_v3 }
   0x2   :  { %2126 = vmatprep.subr.mxu1 %v41_v0  ;;  %2130 = vmatprep.mubr.msk.f32.mxu1 %vm59_vm0, %v28_v2  ;;  %v2659_v4 = vld [vmem:[%s4027_s0 + $0x8] sm:$0xff]  ;;  %v2664_v5 = vld [vmem:[%s4028_s2 + $0x170] sm:$0xff]  ;;  %v2674_v7 = vld [vmem:[%s4028_s2 + $0x158] sm:$0xff] }
   0x3   :  { %2127 = vmatpush3.msra.mxu1 %v41_v0  ;;  %4056 = vst [vmem:[#allocation3_spill] sm:$0xff] %v2664_v5  ;;  %v2669_v6 = vld [vmem:[%s4028_s2 + $0x168] sm:$0xff]  ;;  %v2682_v8 = vld [vmem:[%s4028_s2 + $0x150] sm:$0xff]  ;;  %v2688_v9 = vld [vmem:[%s4028_s2 + $0x140] sm:$0xff]  ;;  %v45_v0 = vshrl.u32 %v44_v63, 7 }
   0x4   :  { %2128 = vmatprep.subr.mxu1 %v38_v1  ;;  %v2694_v10 = vld [vmem:[%s4028_s2 + $0x138] sm:$0xff]  ;;  %v2699_v11 = vld [vmem:[%s4027_s0 + $0x10] sm:$0xff]  ;;  %v2710_v13 = vld [vmem:[%s4028_s2 + $0x128] sm:$0xff] }
   0x5   :  { %2129 = vmatpush3.msra.mxu1 %v38_v1  ;;  %v2704_v12 = vld [vmem:[%s4027_s0 + $0x18] sm:$0xff]  ;;  %v2718_v14 = vld [vmem:[%s4028_s2 + $0x120] sm:$0xff]  ;;  %v2731_v16 = vld [vmem:[%s4028_s2 + $0x110] sm:$0xff]  ;;  %v54_v1 = vsub.s32 2, %v45_v0 }
   0x6   :  { %2131 = vmatmul.mubr.msk.f32.vlgmr.msra.gmra.mxu1 %vm59_vm0, %v2659_v4  ;;  %387 = vmatprep.subr.mxu1 %v2664_v5  ;;  %v2725_v15 = vld [vmem:[%s4027_s0 + $0x20] sm:$0xff]  ;;  %v2738_v17 = vld [vmem:[%s4027_s0 + $0x28] sm:$0xff]  ;;  %v39_v20 = vld [vmem:[%s4026_s1 + $0x18] sm:$0xff] }
   0x7   :  { %388 = vmatpush1.msra.mxu1 %v2669_v6  ;;  %2133 = vmatprep.mubr.msk.f32.mxu1 %vm59_vm0, %v2699_v11  ;;  %v40_v18 = vld [vmem:[%s4026_s1 + $0x20] sm:$0xff]  ;;  %v2747_v19 = vld [vmem:[%s4028_s2 + $0x108] sm:$0xff]  ;;  %v2755_v21 = vld [vmem:[%s4027_s0 + $0x30] sm:$0xff] }
   0x8   :  { %389 = vmatprep.subr.mxu1 %v2674_v7  ;;  %112 = vmatprep.subr.mxu0 %v40_v18  ;;  %v2761_v22 = vld [vmem:[%s4028_s2 + $0xf8] sm:$0xff]  ;;  %v37_v23 = vld [vmem:[%s4026_s1 + $0x8] sm:$0xff]  ;;  %v2770_v24 = vld [vmem:[%s4028_s2 + $0xf0] sm:$0xff] }
   0x9   :  { %390 = vmatpush1.msra.mxu1 %v2682_v8  ;;  %113 = vmatpush1.msra.mxu0 %v39_v20  ;;  %v36_v25 = vld [vmem:[%s4026_s1] sm:$0xff]  ;;  %v2788_v27 = vld [vmem:[%s4027_s0 + $0x38] sm:$0xff]  ;;  %v2800_v29 = vld [vmem:[%s4028_s2 + $0xc8] sm:$0xff] }
   0xa   :  { %391 = vmatprep.subr.mxu1 %v2688_v9  ;;  %2134 = vmatmul.mubr.msk.f32.gmra.mxu1 %vm59_vm0, %v2704_v12  ;;  %v2781_v26 = vld [vmem:[%s4028_s2 + $0xe0] sm:$0xff]  ;;  %v2794_v28 = vld [vmem:[%s4028_s2 + $0xd8] sm:$0xff]  ;;  %v2814_v31 = vld [vmem:[%s4028_s2 + $0xb0] sm:$0xff] }
   0xb   :  { %392 = vmatpush1.msra.mxu1 %v2694_v10  ;;  %2136 = vmatprep.mubr.msk.f32.mxu1 %vm59_vm0, %v2725_v15  ;;  %v2806_v30 = vld [vmem:[%s4028_s2 + $0xc0] sm:$0xff]  ;;  %v2821_v32 = vld [vmem:[%s4028_s2 + $0xa8] sm:$0xff]  ;;  %v2828_v33 = vld [vmem:[%s4028_s2 + $0x98] sm:$0xff] }
   0xc   :  { %393 = vmatprep.subr.mxu1 %v2710_v13  ;;  %114 = vmatprep.subr.mxu0 %v37_v23  ;;  %v2835_v34 = vld [vmem:[%s4028_s2 + $0x90] sm:$0xff]  ;;  %v2842_v35 = vld [vmem:[%s4028_s2 + $0x80] sm:$0xff]  ;;  %v2849_v36 = vld [vmem:[%s4028_s2 + $0x78] sm:$0xff] }
   0xd   :  { %394 = vmatpush1.msra.mxu1 %v2718_v14  ;;  %115 = vmatpush1.msra.mxu0 %v36_v25  ;;  %v2856_v37 = vld [vmem:[%s4028_s2 + $0x68] sm:$0xff]  ;;  %v2864_v38 = vld [vmem:[%s4028_s2 + $0x60] sm:$0xff]  ;;  %v2871_v39 = vld [vmem:[%s4028_s2 + $0x50] sm:$0xff] }
   0xe   :  { %395 = vmatprep.subr.mxu1 %v2731_v16  ;;  %2137 = vmatmul.mubr.msk.f32.gmra.mxu1 %vm59_vm0, %v2738_v17  ;;  %v2878_v40 = vld [vmem:[%s4028_s2 + $0x48] sm:$0xff]  ;;  %v2885_v41 = vld [vmem:[%s4028_s2 + $0x38] sm:$0xff]  ;;  %v2892_v42 = vld [vmem:[%s4028_s2 + $0x30] sm:$0xff] }
   0xf   :  { %396 = vmatpush1.msra.mxu1 %v2747_v19  ;;  %2139 = vmatprep.mubr.msk.f32.mxu1 %vm59_vm0, %v2755_v21  ;;  %v2899_v43 = vld [vmem:[%s4028_s2 + $0x20] sm:$0xff]  ;;  %v2907_v44 = vld [vmem:[%s4028_s2 + $0x18] sm:$0xff]  ;;  %v2914_v45 = vld [vmem:[%s4028_s2 + $0x8] sm:$0xff] }
  0x10   :  { %397 = vmatprep.subr.mxu1 %v2761_v22  ;;  %1915 = vmatmul.mubr.msk.f32.vlgmr.msra.gmra.mxu0 %vm59_vm0, %v28_v2  ;;  %4057 = vst [vmem:[#allocation4_spill] sm:$0xff] %v2907_v44  ;;  %4058 = vst [vmem:[#allocation5_spill] sm:$0xff] %v2914_v45  ;;  %v2921_v46 = vld [vmem:[%s4028_s2] sm:$0xff]  ;;  %v2930_v47 = vld [vmem:[%s4028_s2 + $0x178] sm:$0xff] }
  0x11   :  { %398 = vmatpush1.msra.mxu1 %v2770_v24  ;;  %557 = vmatprep.subr.mxu0 %v2664_v5  ;;  %4059 = vst [vmem:[#allocation6_spill] sm:$0xff] %v2921_v46  ;;  %v2941_v48 = vld [vmem:[%s4028_s2 + $0x160] sm:$0xff]  ;;  %v2950_v49 = vld [vmem:[%s4028_s2 + $0x148] sm:$0xff]  ;;  %v2959_v50 = vld [vmem:[%s4028_s2 + $0x130] sm:$0xff] }
  0x12   :  { %399 = vmatprep.subr.mxu1 %v2781_v26  ;;  %2140 = vmatmul.mubr.msk.f32.gmra.mxu1 %vm59_vm0, %v2788_v27  ;;  %v2968_v51 = vld [vmem:[%s4028_s2 + $0x118] sm:$0xff]  ;;  %v2978_v52 = vld [vmem:[%s4028_s2 + $0x100] sm:$0xff]  ;;  %v2987_v53 = vld [vmem:[%s4028_s2 + $0xe8] sm:$0xff] }
  0x13   :  { %400 = vmatpush1.msra.mxu1 %v2794_v28  ;;  %451 = vmatprep.mubr.f32.mxu1 %v4035_v3  ;;  %v2996_v54 = vld [vmem:[%s4028_s2 + $0xd0] sm:$0xff]  ;;  %v3006_v55 = vld [vmem:[%s4028_s2 + $0xb8] sm:$0xff]  ;;  %v3015_v56 = vld [vmem:[%s4028_s2 + $0xa0] sm:$0xff] }
  0x14   :  { %401 = vmatprep.subr.mxu1 %v2800_v29  ;;  %558 = vmatpush1.msra.mxu0 %v2669_v6  ;;  %v3024_v57 = vld [vmem:[%s4028_s2 + $0x88] sm:$0xff]  ;;  %v3034_v58 = vld [vmem:[%s4028_s2 + $0x70] sm:$0xff]  ;;  %v3043_v59 = vld [vmem:[%s4028_s2 + $0x58] sm:$0xff] }
  0x15   :  { %402 = vmatpush1.msra.mxu1 %v2806_v30  ;;  %154 = vmatprep.mubr.f32.mxu0 %v4035_v3  ;;  %v3052_v60 = vld [vmem:[%s4028_s2 + $0x40] sm:$0xff]  ;;  %v3062_v61 = vld [vmem:[%s4028_s2 + $0x28] sm:$0xff]  ;;  %v3071_v62 = vld [vmem:[%s4028_s2 + $0x10] sm:$0xff] }
  0x16   :  { %403 = vmatprep.subr.mxu1 %v2814_v31  ;;  %559 = vmatprep.subr.mxu0 %v2674_v7  ;;  %4060 = vst [vmem:[#allocation7_spill] sm:$0xff] %v3062_v61  ;;  %4061 = vst [vmem:[#allocation8_spill] sm:$0xff] %v3071_v62  ;;  %v42_v2 = vld [vmem:[%s4029_s3] sm:$0x7] }
  0x17   :  { %404 = vmatpush1.msra.mxu1 %v2821_v32  ;;  %1916 = vmatmul.mubr.msk.f32.gmra.mxu0 %vm59_vm0, %v2659_v4  ;;  %v3120_v4 = vrot.slane %v42_v2, %v54_v1 }
  0x18   :  { %405 = vmatprep.subr.mxu1 %v2828_v33  ;;  %560 = vmatpush1.msra.mxu0 %v2682_v8 }
  0x19   :  { %406 = vmatpush1.msra.mxu1 %v2835_v34  ;;  %561 = vmatprep.subr.mxu0 %v2688_v9 }
  0x1a   :  { %407 = vmatprep.subr.mxu1 %v2842_v35  ;;  %562 = vmatpush1.msra.mxu0 %v2694_v10 }
  0x1b   :  { %408 = vmatpush1.msra.mxu1 %v2849_v36  ;;  %160 = vmatprep.mubr.f32.mxu0 %v4035_v3 }
  0x1c   :  { %409 = vmatprep.subr.mxu1 %v2856_v37  ;;  %563 = vmatprep.subr.mxu0 %v2710_v13 }
  0x1d   :  { %410 = vmatpush1.msra.mxu1 %v2864_v38  ;;  %1917 = vmatmul.mubr.msk.f32.gmra.mxu0 %vm59_vm0, %v2699_v11 }
  0x1e   :  { %411 = vmatprep.subr.mxu1 %v2871_v39  ;;  %564 = vmatpush1.msra.mxu0 %v2718_v14 }
  0x1f   :  { %412 = vmatpush1.msra.mxu1 %v2878_v40  ;;  %565 = vmatprep.subr.mxu0 %v2731_v16 }
  0x20   :  { %413 = vmatprep.subr.mxu1 %v2885_v41  ;;  %566 = vmatpush1.msra.mxu0 %v2747_v19 }
  0x21   :  { %414 = vmatpush1.msra.mxu1 %v2892_v42  ;;  %166 = vmatprep.mubr.f32.mxu0 %v4035_v3 }
  0x22   :  { %415 = vmatprep.subr.mxu1 %v2899_v43  ;;  %567 = vmatprep.subr.mxu0 %v2761_v22 }
  0x23   :  { %416 = vmatpush1.msra.mxu1 %v2907_v44  ;;  %1918 = vmatmul.mubr.msk.f32.gmra.mxu0 %vm59_vm0, %v2704_v12 }
  0x24   :  { %417 = vmatprep.subr.mxu1 %v2914_v45  ;;  %568 = vmatpush1.msra.mxu0 %v2770_v24 }
  0x25   :  { %418 = vmatpush1.msra.mxu1 %v2921_v46  ;;  %569 = vmatprep.subr.mxu0 %v2781_v26 }
  0x26   :  { %452 = vmatmul.mubr.f32.vlgmr.msra.gmra.mxu1 %v4035_v3  ;;  %2142 = vmatprep.subr.mxu1 %v4035_v3 }
  0x27   :  { %2143 = vmatpush3.msra.mxu1 %v2930_v47  ;;  %2174 = vmatprep.mubr.msk.f32.mxu1 %vm2599_vm1, %v4035_v3 }
  0x28   :  { %2144 = vmatprep.subr.mxu1 %v4035_v3  ;;  %570 = vmatpush1.msra.mxu0 %v2794_v28 }
  0x29   :  { %2145 = vmatpush3.msra.mxu1 %v2941_v48  ;;  %172 = vmatprep.mubr.f32.mxu0 %v4035_v3 }
  0x2a   :  { %2146 = vmatprep.subr.mxu1 %v4035_v3  ;;  %571 = vmatprep.subr.mxu0 %v2800_v29 }
  0x2b   :  { %2147 = vmatpush3.msra.mxu1 %v2950_v49  ;;  %1919 = vmatmul.mubr.msk.f32.gmra.mxu0 %vm59_vm0, %v2725_v15 }
  0x2c   :  { %2148 = vmatprep.subr.mxu1 %v4035_v3  ;;  %572 = vmatpush1.msra.mxu0 %v2806_v30 }
  0x2d   :  { %2149 = vmatpush3.msra.mxu1 %v2959_v50  ;;  %573 = vmatprep.subr.mxu0 %v2814_v31 }
  0x2e   :  { %2150 = vmatprep.subr.mxu1 %v4035_v3  ;;  %574 = vmatpush1.msra.mxu0 %v2821_v32 }
  0x2f   :  { %2151 = vmatpush3.msra.mxu1 %v2968_v51  ;;  %178 = vmatprep.mubr.f32.mxu0 %v4035_v3 }
  0x30   :  { %2152 = vmatprep.subr.mxu1 %v4035_v3  ;;  %575 = vmatprep.subr.mxu0 %v2828_v33 }
  0x31   :  { %2153 = vmatpush3.msra.mxu1 %v2978_v52  ;;  %1920 = vmatmul.mubr.msk.f32.gmra.mxu0 %vm59_vm0, %v2738_v17 }
  0x32   :  { %2154 = vmatprep.subr.mxu1 %v4035_v3  ;;  %576 = vmatpush1.msra.mxu0 %v2835_v34 }
  0x33   :  { %2155 = vmatpush3.msra.mxu1 %v2987_v53  ;;  %577 = vmatprep.subr.mxu0 %v2842_v35 }
  0x34   :  { %2156 = vmatprep.subr.mxu1 %v4035_v3  ;;  %578 = vmatpush1.msra.mxu0 %v2849_v36 }
  0x35   :  { %2157 = vmatpush3.msra.mxu1 %v2996_v54  ;;  %184 = vmatprep.mubr.f32.mxu0 %v4035_v3 }
  0x36   :  { %2158 = vmatprep.subr.mxu1 %v4035_v3  ;;  %579 = vmatprep.subr.mxu0 %v2856_v37 }
  0x37   :  { %2159 = vmatpush3.msra.mxu1 %v3006_v55  ;;  %1921 = vmatmul.mubr.msk.f32.gmra.mxu0 %vm59_vm0, %v2755_v21 }
  0x38   :  { %2160 = vmatprep.subr.mxu1 %v4035_v3  ;;  %580 = vmatpush1.msra.mxu0 %v2864_v38 }
  0x39   :  { %2161 = vmatpush3.msra.mxu1 %v3015_v56  ;;  %581 = vmatprep.subr.mxu0 %v2871_v39 }
  0x3a   :  { %2162 = vmatprep.subr.mxu1 %v4035_v3  ;;  %582 = vmatpush1.msra.mxu0 %v2878_v40 }
  0x3b   :  { %2163 = vmatpush3.msra.mxu1 %v3024_v57  ;;  %190 = vmatprep.mubr.f32.mxu0 %v4035_v3 }
  0x3c   :  { %2164 = vmatprep.subr.mxu1 %v4035_v3  ;;  %583 = vmatprep.subr.mxu0 %v2885_v41 }
  0x3d   :  { %2165 = vmatpush3.msra.mxu1 %v3034_v58  ;;  %1922 = vmatmul.mubr.msk.f32.gmra.mxu0 %vm59_vm0, %v2788_v27 }
  0x3e   :  { %2166 = vmatprep.subr.mxu1 %v4035_v3  ;;  %584 = vmatpush1.msra.mxu0 %v2892_v42 }
  0x3f   :  { %2167 = vmatpush3.msra.mxu1 %v3043_v59  ;;  %585 = vmatprep.subr.mxu0 %v2899_v43 }
  0x40   :  { %2168 = vmatprep.subr.mxu1 %v4035_v3  ;;  %586 = vmatpush1.msra.mxu0 %v2907_v44 }
  0x41   :  { %2169 = vmatpush3.msra.mxu1 %v3052_v60  ;;  %587 = vmatprep.subr.mxu0 %v2914_v45 }
  0x42   :  { %2170 = vmatprep.subr.mxu1 %v4035_v3  ;;  %588 = vmatpush1.msra.mxu0 %v2921_v46 }
  0x43   :  { %2171 = vmatpush3.msra.mxu1 %v3062_v61  ;;  %621 = vmatprep.mubr.f32.mxu0 %v4035_v3 }
  0x44   :  { %2172 = vmatprep.subr.mxu1 %v4035_v3  ;;  %728 = vmatprep.subr.mxu0 %v2664_v5 }
  0x45   :  { %2173 = vmatpush3.msra.mxu1 %v3071_v62 }
  0x46   :  { %2175 = vmatmul.mubr.f32.vlgmr.msra.gmra.mxu1 %v4035_v3  ;;  %2177 = vmatprep.subr.mxu1 %v4035_v3 }
  0x47   :  { %2178 = vmatpush3.msra.mxu1 %v2930_v47  ;;  %2209 = vmatprep.mubr.msk.f32.mxu1 %vm2599_vm1, %v4035_v3 }
  0x48   :  { %2179 = vmatprep.subr.mxu1 %v4035_v3 }
  0x49   :  { %2180 = vmatpush3.msra.mxu1 %v2941_v48 }
  0x4a   :  { %2181 = vmatprep.subr.mxu1 %v4035_v3 }
  0x4b   :  { %2182 = vmatpush3.msra.mxu1 %v2950_v49 }
  0x4c   :  { %2183 = vmatprep.subr.mxu1 %v4035_v3 }
  0x4d   :  { %2184 = vmatpush3.msra.mxu1 %v2959_v50 }
  0x4e   :  { %2185 = vmatprep.subr.mxu1 %v4035_v3 }
  0x4f   :  { %2186 = vmatpush3.msra.mxu1 %v2968_v51 }
  0x50   :  { %2187 = vmatprep.subr.mxu1 %v4035_v3 }
  0x51   :  { %2188 = vmatpush3.msra.mxu1 %v2978_v52 }
  0x52   :  { %2189 = vmatprep.subr.mxu1 %v4035_v3 }
  0x53   :  { %2190 = vmatpush3.msra.mxu1 %v2987_v53 }
  0x54   :  { %2191 = vmatprep.subr.mxu1 %v4035_v3 }
  0x55   :  { %2192 = vmatpush3.msra.mxu1 %v2996_v54 }
  0x56   :  { %2193 = vmatprep.subr.mxu1 %v4035_v3 }
  0x57   :  { %2194 = vmatpush3.msra.mxu1 %v3006_v55 }
  0x58   :  { %2195 = vmatprep.subr.mxu1 %v4035_v3 }
  0x59   :  { %2196 = vmatpush3.msra.mxu1 %v3015_v56 }
  0x5a   :  { %2197 = vmatprep.subr.mxu1 %v4035_v3 }
  0x5b   :  { %2198 = vmatpush3.msra.mxu1 %v3024_v57 }
  0x5c   :  { %2199 = vmatprep.subr.mxu1 %v4035_v3 }
  0x5d   :  { %2200 = vmatpush3.msra.mxu1 %v3034_v58 }
  0x5e   :  { %2201 = vmatprep.subr.mxu1 %v4035_v3 }
  0x5f   :  { %2202 = vmatpush3.msra.mxu1 %v3043_v59 }
  0x60   :  { %2203 = vmatprep.subr.mxu1 %v4035_v3 }
  0x61   :  { %2204 = vmatpush3.msra.mxu1 %v3052_v60 }
  0x62   :  { %2205 = vmatprep.subr.mxu1 %v4035_v3 }
  0x63   :  { %2206 = vmatpush3.msra.mxu1 %v3062_v61 }
  0x64   :  { %2207 = vmatprep.subr.mxu1 %v4035_v3 }
  0x65   :  { %2208 = vmatpush3.msra.mxu1 %v3071_v62 }
  0x66   :  { %2212 = vmatprep.subr.mxu1 %v4035_v3 }
  0xc6   :  { %v2132_v11 = vpop.f32.mrf.mxu1 }
  0xc7   :  { %v3123_v12 = vadd.f32 %v2132_v11, %v3120_v4 }
  0xc8   :  { %v3125_v15 = vpop.f32.mrf.mxu1 }
  0xc9   :  { %4062 = vst [vmem:[#allocation9_spill] sm:$0xff] %v3123_v12 }
  0xca   :  { %v2135_v17 = vpop.f32.mrf.mxu1 }
  0xcb   :  { %v3128_v18 = vadd.f32 %v2135_v17, %v3120_v4 }
  0xcc   :  { %v273_v20 = vpop.f32.mrf.mxu1 }
  0xcd   :  { %4063 = vst [vmem:[#allocation10_spill] sm:$0xff] %v3128_v18  ;;  %v3131_v21 = vadd.f32 %v273_v20, %v3120_v4 }
  0xce   :  { %v2138_v23 = vpop.f32.mrf.mxu1 }
  0xcf   :  { %4064 = vst [vmem:[#allocation11_spill] sm:$0xff] %v3131_v21  ;;  %v3134_v25 = vadd.f32 %v2138_v23, %v3120_v4  ;;  %v46_v21 = vsub.s32 0, %v45_v0  ;;  %v50_v23 = vsub.s32 1, %v45_v0 }
  0xd0   :  { %v283_v27 = vpop.f32.mrf.mxu1  ;;  %v150_v3 = vpop.f32.mrf.mxu0 }
  0xd1   :  { %4065 = vst [vmem:[#allocation12_spill] sm:$0xff] %v3134_v25  ;;  %v3137_v63 = vadd.f32 %v283_v27, %v3120_v4  ;;  %v3149_v25 = vrot.slane %v42_v2, %v46_v21 }
  0xd2   :  { %v2141_v1 = vpop.f32.mrf.mxu1  ;;  %v152_v18 = vpop.f32.mrf.mxu0 }
  0xd3   :  { %4066 = vst [vmem:[#allocation13_spill] sm:$0xff] %v3137_v63  ;;  %v3140_v11 = vadd.f32 %v2141_v1, %v3120_v4  ;;  %v3151_v63 = vrot.slane %v42_v2, %v50_v23 }
  0xd4   :  { %v293_v12 = vpop.f32.mrf.mxu1 }
  0xd5   :  { %4067 = vst [vmem:[#allocation14_spill] sm:$0xff] %v3140_v11  ;;  %v3143_v17 = vadd.f32 %v293_v12, %v3120_v4  ;;  %4071 = vst [vmem:[#allocation18_spill] sm:$0xff] %v3151_v63  ;;  %v151_v12 = vadd.f32 %v150_v3, %v3149_v25 }
  0xd7   :  { %4068 = vst [vmem:[#allocation15_spill] sm:$0xff] %v3143_v17  ;;  %v3145_v20 = vpop.f32.mrf.mxu0 }
  0xd8   :  { %4069 = vst [vmem:[#allocation16_spill] sm:$0xff] %v3145_v20 }
  0xd9   :  { %v3147_v5 = vpop.f32.mrf.mxu0 }
  0xda   :  { %4070 = vst [vmem:[#allocation17_spill] sm:$0xff] %v3147_v5 }
  0xdd   :  { %v162_v27 = vpop.f32.mrf.mxu0 }
  0xde   :  { %v3154_v1 = vadd.f32 %v162_v27, %v3149_v25  ;;  %v153_v27 = vadd.f32 %v152_v18, %v3151_v63 }
  0xdf   :  { %v164_v11 = vpop.f32.mrf.mxu0 }
  0xe0   :  { %4072 = vst [vmem:[#allocation19_spill] sm:$0xff] %v3154_v1  ;;  %v3157_v62 = vadd.f32 %v164_v11, %v3151_v63 }
  0xe2   :  { %4073 = vst [vmem:[#allocation20_spill] sm:$0xff] %v3157_v62 }
  0xe3   :  { %v168_v17 = vpop.f32.mrf.mxu0 }
  0xe4   :  { %v3161_v46 = vadd.f32 %v168_v17, %v3149_v25 }
  0xe5   :  { %v170_v21 = vpop.f32.mrf.mxu0 }
  0xe6   :  { %v453_v20 = vpop.f32.mrf.mxu1  ;;  %4074 = vst [vmem:[#allocation21_spill] sm:$0xff] %v3161_v46  ;;  %v3164_v5 = vadd.f32 %v170_v21, %v3151_v63 }
  0xe7   :  { %v528_v0 = vadd.f32 %v453_v20, %v151_v12 }
  0xe8   :  { %4075 = vst [vmem:[#allocation22_spill] sm:$0xff] %v3164_v5  ;;  %v455_v23 = vpop.f32.mrf.mxu1 }
  0xe9   :  { %v1932_v2 = vmul.f32 -1.442695, %v528_v0  ;;  %v529_v1 = vadd.f32 %v455_v23, %v153_v27 }
  0xeb   :  { %2468 = vpow2.f32 %v1932_v2  ;;  %v174_v11 = vpop.f32.mrf.mxu0  ;;  %v1933_v17 = vmul.f32 -1.442695, %v529_v1 }
  0xec   :  { %v3168_v62 = vadd.f32 %v174_v11, %v3149_v25 }
  0xed   :  { %v176_v3 = vpop.f32.mrf.mxu0  ;;  %2470 = vpow2.f32 %v1933_v17 }
  0xee   :  { %4076 = vst [vmem:[#allocation23_spill] sm:$0xff] %v3168_v62  ;;  %v3171_v45 = vadd.f32 %v176_v3, %v3151_v63 }
  0xf0   :  { %4077 = vst [vmem:[#allocation24_spill] sm:$0xff] %v3171_v45 }
  0xf1   :  { %v180_v20 = vpop.f32.mrf.mxu0 }
  0xf2   :  { %v3174_v12 = vadd.f32 %v180_v20, %v3149_v25 }
  0xf3   :  { %v182_v0 = vpop.f32.mrf.mxu0 }
  0xf4   :  { %4078 = vst [vmem:[#allocation25_spill] sm:$0xff] %v3174_v12  ;;  %v3177_v21 = vadd.f32 %v182_v0, %v3151_v63  ;;  %v3191_v0 = vld [vmem:[%s4030_s4] ss:$0 sm:$0xff] }
  0xf6   :  { %4079 = vst [vmem:[#allocation26_spill] sm:$0xff] %v3177_v21 }
  0xf7   :  { %v186_v23 = vpop.f32.mrf.mxu0 }
  0xf8   :  { %v2469_v18 = vpop.eup %2468  ;;  %v3180_v27 = vadd.f32 %v186_v23, %v3149_v25 }
  0xf9   :  { %v536_v2 = vadd.f32 1.0, %v2469_v18  ;;  %v188_v11 = vpop.f32.mrf.mxu0 }
  0xfa   :  { %4080 = vst [vmem:[#allocation27_spill] sm:$0xff] %v3180_v27  ;;  %v3183_v3 = vadd.f32 %v188_v11, %v3151_v63  ;;  %v2471_v17 = vpop.eup %2470  ;;  %v264_v11 = vadd.f32 %v3125_v15, %v3120_v4  ;;  %v4083_v4 = vmov 0.0   ;;  %v4087_v15 = vld [vmem:[#allocation3_spill] sm:$0xff] }
  0xfb   :  { %2472 = vrcp.f32 %v536_v2  ;;  %v537_v18 = vadd.f32 1.0, %v2471_v17 }
  0xfc   :  { %4081 = vst [vmem:[#allocation28_spill] sm:$0xff] %v3183_v3 }
  0xfd   :  { %v192_v1 = vpop.f32.mrf.mxu0  ;;  %2474 = vrcp.f32 %v537_v18 }
  0xfe   :  { %v3186_v20 = vadd.f32 %v192_v1, %v3149_v25 }
 0x100   :  { %4082 = vst [vmem:[#allocation29_spill] sm:$0xff] %v3186_v20 }
 0x106   :  { %v524_v21 = vpop.f32.mrf.mxu1 }
 0x107   :  { %v542_v23 = vadd.f32 %v3191_v0, %v524_v21  ;;  %v4089_v21 = vld [vmem:[#allocation16_spill] sm:$0xff] }
 0x108   :  { %v2473_v27 = vpop.eup %2472  ;;  %v2176_v2 = vpop.f32.mrf.mxu1 }
 0x109   :  { %v543_v3 = vmul.f32 %v2473_v27, %v542_v23  ;;  %v157_v27 = vadd.f32 %v4089_v21, %v3149_v25 }
 0x10a   :  { %v2475_v1 = vpop.eup %2474 }
 0x10b   :  { %v544_v12 = vadd.f32 %v543_v3, %v264_v11  ;;  %v546_v20 = vsub.f32 1.0, %v2475_v1  ;;  %v548_v5 = vmul.f32 0.0, %v2475_v1  ;;  %v4090_v11 = vld [vmem:[#allocation17_spill] sm:$0xff] }
 0x10c   :  { %v159_v1 = vadd.f32 %v4090_v11, %v3151_v63 }
 0x10d   :  { %2476 = vtanh.f32 %v544_v12  ;;  %v3271_v12 = vpop.f32.mrf.mxu0 }
 0x10e   :  { %4088 = vst [vmem:[#allocation30_spill] sm:$0xff] %v3271_v12 }
 0x11a   :  { %v2477_v45 = vpop.eup %2476 }
 0x11b   :  { %v547_v62 = vmul.f32 %v2477_v45, %v546_v20  ;;  %v4085_v45 = vld [vmem:[#allocation6_spill] sm:$0xff] }
 0x11d   :  { %v3196_v46 = vadd.f32 %v548_v5, %v547_v62  ;;  %v4084_v5 = vld [vmem:[#allocation5_spill] sm:$0xff]  ;;  %v4086_v62 = vld [vmem:[#allocation8_spill] sm:$0xff] }
 0x11f   :  { %550 = vst [vmem:[%s4031_s7] sm:$0xff] %v3196_v46  ;;  %622 = vmatmul.mubr.f32.vlgmr.msra.gmra.mxu0 %v3196_v46  ;;  %2210 = vmatmul.mubr.f32.vlgmr.msra.gmra.mxu1 %v3196_v46 }
 0x120   :  { %729 = vmatpush1.msra.mxu0 %v2669_v6  ;;  %2213 = vmatpush3.msra.mxu1 %v2930_v47 }
 0x121   :  { %730 = vmatprep.subr.mxu0 %v2674_v7  ;;  %2214 = vmatprep.subr.mxu1 %v4083_v4 }
 0x122   :  { %731 = vmatpush1.msra.mxu0 %v2682_v8  ;;  %2215 = vmatpush3.msra.mxu1 %v2941_v48 }
 0x123   :  { %732 = vmatprep.subr.mxu0 %v2688_v9  ;;  %2216 = vmatprep.subr.mxu1 %v4083_v4 }
 0x124   :  { %733 = vmatpush1.msra.mxu0 %v2694_v10  ;;  %2217 = vmatpush3.msra.mxu1 %v2950_v49 }
 0x125   :  { %734 = vmatprep.subr.mxu0 %v2710_v13  ;;  %2218 = vmatprep.subr.mxu1 %v4083_v4 }
 0x126   :  { %735 = vmatpush1.msra.mxu0 %v2718_v14  ;;  %2219 = vmatpush3.msra.mxu1 %v2959_v50 }
 0x127   :  { %736 = vmatprep.subr.mxu0 %v2731_v16  ;;  %2220 = vmatprep.subr.mxu1 %v4083_v4 }
 0x128   :  { %737 = vmatpush1.msra.mxu0 %v2747_v19  ;;  %2221 = vmatpush3.msra.mxu1 %v2968_v51 }
 0x129   :  { %738 = vmatprep.subr.mxu0 %v2761_v22  ;;  %2222 = vmatprep.subr.mxu1 %v4083_v4 }
 0x12a   :  { %739 = vmatpush1.msra.mxu0 %v2770_v24  ;;  %2223 = vmatpush3.msra.mxu1 %v2978_v52 }
 0x12b   :  { %740 = vmatprep.subr.mxu0 %v2781_v26  ;;  %2224 = vmatprep.subr.mxu1 %v4083_v4 }
 0x12c   :  { %741 = vmatpush1.msra.mxu0 %v2794_v28  ;;  %2225 = vmatpush3.msra.mxu1 %v2987_v53 }
 0x12d   :  { %742 = vmatprep.subr.mxu0 %v2800_v29  ;;  %2226 = vmatprep.subr.mxu1 %v4083_v4 }
 0x12e   :  { %743 = vmatpush1.msra.mxu0 %v2806_v30  ;;  %2227 = vmatpush3.msra.mxu1 %v2996_v54 }
 0x12f   :  { %744 = vmatprep.subr.mxu0 %v2814_v31  ;;  %2228 = vmatprep.subr.mxu1 %v4083_v4 }
 0x130   :  { %745 = vmatpush1.msra.mxu0 %v2821_v32  ;;  %2229 = vmatpush3.msra.mxu1 %v3006_v55 }
 0x131   :  { %746 = vmatprep.subr.mxu0 %v2828_v33  ;;  %2230 = vmatprep.subr.mxu1 %v4083_v4 }
 0x132   :  { %747 = vmatpush1.msra.mxu0 %v2835_v34  ;;  %2231 = vmatpush3.msra.mxu1 %v3015_v56 }
 0x133   :  { %748 = vmatprep.subr.mxu0 %v2842_v35  ;;  %2232 = vmatprep.subr.mxu1 %v4083_v4 }
 0x134   :  { %749 = vmatpush1.msra.mxu0 %v2849_v36  ;;  %2233 = vmatpush3.msra.mxu1 %v3024_v57 }
 0x135   :  { %750 = vmatprep.subr.mxu0 %v2856_v37  ;;  %2234 = vmatprep.subr.mxu1 %v4083_v4 }
 0x136   :  { %751 = vmatpush1.msra.mxu0 %v2864_v38  ;;  %2235 = vmatpush3.msra.mxu1 %v3034_v58 }
 0x137   :  { %752 = vmatprep.subr.mxu0 %v2871_v39  ;;  %2236 = vmatprep.subr.mxu1 %v4083_v4 }
 0x138   :  { %753 = vmatpush1.msra.mxu0 %v2878_v40  ;;  %2237 = vmatpush3.msra.mxu1 %v3043_v59 }
 0x139   :  { %754 = vmatprep.subr.mxu0 %v2885_v41  ;;  %2238 = vmatprep.subr.mxu1 %v4083_v4 }
 0x13a   :  { %755 = vmatpush1.msra.mxu0 %v2892_v42  ;;  %2239 = vmatpush3.msra.mxu1 %v3052_v60 }
 0x13b   :  { %756 = vmatprep.subr.mxu0 %v2899_v43  ;;  %2240 = vmatprep.subr.mxu1 %v4083_v4 }
 0x13c   :  { %757 = vmatpush1.msra.mxu0 %v2907_v44  ;;  %2241 = vmatpush3.msra.mxu1 %v3062_v61 }
 0x13d   :  { %758 = vmatprep.subr.mxu0 %v4084_v5  ;;  %2242 = vmatprep.subr.mxu1 %v4083_v4 }
 0x13e   :  { %759 = vmatpush1.msra.mxu0 %v4085_v45  ;;  %792 = vmatprep.mubr.f32.mxu0 %v4083_v4 }
 0x13f   :  { %2243 = vmatpush3.msra.mxu1 %v4086_v62  ;;  %2244 = vmatprep.mubr.msk.f32.mxu1 %vm2599_vm1, %v4083_v4 }
 0x140   :  { %899 = vmatprep.subr.mxu0 %v4087_v15  ;;  %2247 = vmatprep.subr.mxu1 %v4083_v4 }
 0x1df   :  { %v623_v3 = vpop.f32.mrf.mxu0  ;;  %v694_v20 = vpop.f32.mrf.mxu1 }
 0x1e0   :  { %v698_v17 = vadd.f32 %v623_v3, %v157_v27  ;;  %v712_v25 = vadd.f32 %v3191_v0, %v694_v20  ;;  %v4091_v27 = vld [vmem:[#allocation9_spill] sm:$0xff] }
 0x1e1   :  { %v2211_v18 = vpop.f32.mrf.mxu1  ;;  %v625_v2 = vpop.f32.mrf.mxu0 }
 0x1e2   :  { %v1934_v23 = vmul.f32 -1.442695, %v698_v17  ;;  %v699_v62 = vadd.f32 %v625_v2, %v159_v1  ;;  %v4098_v1 = vld [vmem:[#allocation19_spill] sm:$0xff] }
 0x1e4   :  { %2478 = vpow2.f32 %v1934_v23  ;;  %v1935_v45 = vmul.f32 -1.442695, %v699_v62 }
 0x1e6   :  { %2480 = vpow2.f32 %v1935_v45 }
 0x1f1   :  { %v2479_v15 = vpop.eup %2478 }
 0x1f2   :  { %v706_v5 = vadd.f32 1.0, %v2479_v15  ;;  %v4096_v15 = vld [vmem:[#allocation8_spill] sm:$0xff] }
 0x1f3   :  { %v2481_v12 = vpop.eup %2480 }
 0x1f4   :  { %2482 = vrcp.f32 %v706_v5  ;;  %v707_v61 = vadd.f32 1.0, %v2481_v12  ;;  %v4095_v5 = vld [vmem:[#allocation6_spill] sm:$0xff]  ;;  %v4097_v12 = vld [vmem:[#allocation3_spill] sm:$0xff] }
 0x1f6   :  { %2484 = vrcp.f32 %v707_v61  ;;  %v4094_v61 = vld [vmem:[#allocation5_spill] sm:$0xff] }
 0x201   :  { %v2483_v21 = vpop.eup %2482 }
 0x202   :  { %v713_v44 = vmul.f32 %v2483_v21, %v712_v25 }
 0x203   :  { %v2485_v17 = vpop.eup %2484 }
 0x204   :  { %v714_v3 = vadd.f32 %v713_v44, %v4091_v27  ;;  %v716_v18 = vsub.f32 1.0, %v2485_v17  ;;  %v718_v62 = vmul.f32 %v2485_v17, %v3196_v46  ;;  %v4092_v44 = vld [vmem:[#allocation4_spill] sm:$0xff]  ;;  %v4093_v46 = vld [vmem:[#allocation7_spill] sm:$0xff] }
 0x205   :  { %v4099_v17 = vld [vmem:[#allocation20_spill] sm:$0xff] }
 0x206   :  { %2486 = vtanh.f32 %v714_v3 }
 0x213   :  { %v2487_v11 = vpop.eup %2486 }
 0x214   :  { %v717_v23 = vmul.f32 %v2487_v11, %v716_v18 }
 0x216   :  { %v3280_v45 = vadd.f32 %v718_v62, %v717_v23 }
 0x218   :  { %1936 = vst [vmem:[%s4031_s7 + $0x8] sm:$0xff] %v3280_v45  ;;  %793 = vmatmul.mubr.f32.vlgmr.msra.gmra.mxu0 %v3280_v45  ;;  %2245 = vmatmul.mubr.f32.vlgmr.msra.gmra.mxu1 %v3280_v45 }
 0x219   :  { %900 = vmatpush1.msra.mxu0 %v2669_v6  ;;  %2248 = vmatpush3.msra.mxu1 %v2930_v47 }
 0x21a   :  { %901 = vmatprep.subr.mxu0 %v2674_v7  ;;  %2249 = vmatprep.subr.mxu1 %v4083_v4 }
 0x21b   :  { %902 = vmatpush1.msra.mxu0 %v2682_v8  ;;  %2250 = vmatpush3.msra.mxu1 %v2941_v48 }
 0x21c   :  { %903 = vmatprep.subr.mxu0 %v2688_v9  ;;  %2251 = vmatprep.subr.mxu1 %v4083_v4 }
 0x21d   :  { %904 = vmatpush1.msra.mxu0 %v2694_v10  ;;  %2252 = vmatpush3.msra.mxu1 %v2950_v49 }
 0x21e   :  { %905 = vmatprep.subr.mxu0 %v2710_v13  ;;  %2253 = vmatprep.subr.mxu1 %v4083_v4 }
 0x21f   :  { %906 = vmatpush1.msra.mxu0 %v2718_v14  ;;  %2254 = vmatpush3.msra.mxu1 %v2959_v50 }
 0x220   :  { %907 = vmatprep.subr.mxu0 %v2731_v16  ;;  %2255 = vmatprep.subr.mxu1 %v4083_v4 }
 0x221   :  { %908 = vmatpush1.msra.mxu0 %v2747_v19  ;;  %2256 = vmatpush3.msra.mxu1 %v2968_v51 }
 0x222   :  { %909 = vmatprep.subr.mxu0 %v2761_v22  ;;  %2257 = vmatprep.subr.mxu1 %v4083_v4 }
 0x223   :  { %910 = vmatpush1.msra.mxu0 %v2770_v24  ;;  %2258 = vmatpush3.msra.mxu1 %v2978_v52 }
 0x224   :  { %911 = vmatprep.subr.mxu0 %v2781_v26  ;;  %2259 = vmatprep.subr.mxu1 %v4083_v4 }
 0x225   :  { %912 = vmatpush1.msra.mxu0 %v2794_v28  ;;  %2260 = vmatpush3.msra.mxu1 %v2987_v53 }
 0x226   :  { %913 = vmatprep.subr.mxu0 %v2800_v29  ;;  %2261 = vmatprep.subr.mxu1 %v4083_v4 }
 0x227   :  { %914 = vmatpush1.msra.mxu0 %v2806_v30  ;;  %2262 = vmatpush3.msra.mxu1 %v2996_v54 }
 0x228   :  { %915 = vmatprep.subr.mxu0 %v2814_v31  ;;  %2263 = vmatprep.subr.mxu1 %v4083_v4 }
 0x229   :  { %916 = vmatpush1.msra.mxu0 %v2821_v32  ;;  %2264 = vmatpush3.msra.mxu1 %v3006_v55 }
 0x22a   :  { %917 = vmatprep.subr.mxu0 %v2828_v33  ;;  %2265 = vmatprep.subr.mxu1 %v4083_v4 }
 0x22b   :  { %918 = vmatpush1.msra.mxu0 %v2835_v34  ;;  %2266 = vmatpush3.msra.mxu1 %v3015_v56 }
 0x22c   :  { %919 = vmatprep.subr.mxu0 %v2842_v35  ;;  %2267 = vmatprep.subr.mxu1 %v4083_v4 }
 0x22d   :  { %920 = vmatpush1.msra.mxu0 %v2849_v36  ;;  %2268 = vmatpush3.msra.mxu1 %v3024_v57 }
 0x22e   :  { %921 = vmatprep.subr.mxu0 %v2856_v37  ;;  %2269 = vmatprep.subr.mxu1 %v4083_v4 }
 0x22f   :  { %922 = vmatpush1.msra.mxu0 %v2864_v38  ;;  %2270 = vmatpush3.msra.mxu1 %v3034_v58 }
 0x230   :  { %923 = vmatprep.subr.mxu0 %v2871_v39  ;;  %2271 = vmatprep.subr.mxu1 %v4083_v4 }
 0x231   :  { %924 = vmatpush1.msra.mxu0 %v2878_v40  ;;  %2272 = vmatpush3.msra.mxu1 %v3043_v59 }
 0x232   :  { %925 = vmatprep.subr.mxu0 %v2885_v41  ;;  %2273 = vmatprep.subr.mxu1 %v4083_v4 }
 0x233   :  { %926 = vmatpush1.msra.mxu0 %v2892_v42  ;;  %2274 = vmatpush3.msra.mxu1 %v3052_v60 }
 0x234   :  { %927 = vmatprep.subr.mxu0 %v2899_v43  ;;  %2275 = vmatprep.subr.mxu1 %v4083_v4 }
 0x235   :  { %928 = vmatpush1.msra.mxu0 %v4092_v44  ;;  %2276 = vmatpush3.msra.mxu1 %v4093_v46  ;;  %v4100_v46 = vld [vmem:[#allocation11_spill] sm:$0xff] }
 0x236   :  { %929 = vmatprep.subr.mxu0 %v4094_v61  ;;  %2277 = vmatprep.subr.mxu1 %v4083_v4 }
 0x237   :  { %930 = vmatpush1.msra.mxu0 %v4095_v5  ;;  %963 = vmatprep.mubr.f32.mxu0 %v4083_v4 }
 0x238   :  { %2278 = vmatpush3.msra.mxu1 %v4096_v15  ;;  %2279 = vmatprep.mubr.msk.f32.mxu1 %vm2599_vm1, %v4083_v4 }
 0x239   :  { %1070 = vmatprep.subr.mxu0 %v4097_v12  ;;  %2282 = vmatprep.subr.mxu1 %v4083_v4 }
 0x2d8   :  { %v794_v20 = vpop.f32.mrf.mxu0  ;;  %v865_v2 = vpop.f32.mrf.mxu1 }
 0x2d9   :  { %v869_v25 = vadd.f32 %v794_v20, %v4098_v1  ;;  %v883_v12 = vadd.f32 %v3191_v0, %v865_v2  ;;  %v3512_v2 = vld [vmem:[%s4028_s2 + $0x108] sm:$0xff] }
 0x2da   :  { %v2246_v21 = vpop.f32.mrf.mxu1  ;;  %v796_v3 = vpop.f32.mrf.mxu0 }
 0x2db   :  { %v1937_v27 = vmul.f32 -1.442695, %v869_v25  ;;  %v870_v18 = vadd.f32 %v796_v3, %v4099_v17 }
 0x2dd   :  { %2488 = vpow2.f32 %v1937_v27  ;;  %v1938_v11 = vmul.f32 -1.442695, %v870_v18  ;;  %v3526_v18 = vld [vmem:[%s4028_s2 + $0xf0] sm:$0xff] }
 0x2df   :  { %2490 = vpow2.f32 %v1938_v11  ;;  %v3540_v11 = vld [vmem:[%s4028_s2 + $0xd8] sm:$0xff] }
 0x2ea   :  { %v2489_v23 = vpop.eup %2488 }
 0x2eb   :  { %v877_v62 = vadd.f32 1.0, %v2489_v23  ;;  %v3554_v23 = vld [vmem:[%s4028_s2 + $0xc0] sm:$0xff] }
 0x2ec   :  { %v2491_v63 = vpop.eup %2490 }
 0x2ed   :  { %2492 = vrcp.f32 %v877_v62  ;;  %v878_v15 = vadd.f32 1.0, %v2491_v63  ;;  %v3568_v62 = vld [vmem:[%s4028_s2 + $0xa8] sm:$0xff] }
 0x2ef   :  { %2494 = vrcp.f32 %v878_v15  ;;  %v3498_v15 = vld [vmem:[%s4028_s2 + $0x120] sm:$0xff] }
 0x2fa   :  { %v2493_v5 = vpop.eup %2492 }
 0x2fb   :  { %v884_v61 = vmul.f32 %v2493_v5, %v883_v12  ;;  %v3484_v5 = vld [vmem:[%s4028_s2 + $0x138] sm:$0xff]  ;;  %v3582_v12 = vld [vmem:[%s4028_s2 + $0x90] sm:$0xff] }
 0x2fc   :  { %v2495_v1 = vpop.eup %2494 }
 0x2fd   :  { %v885_v20 = vadd.f32 %v884_v61, %v4100_v46  ;;  %v887_v25 = vsub.f32 1.0, %v2495_v1  ;;  %v889_v3 = vmul.f32 %v2495_v1, %v3280_v45  ;;  %v3463_v46 = vld [vmem:[%s4028_s2 + $0x158] sm:$0xff]  ;;  %v3470_v61 = vld [vmem:[%s4028_s2 + $0x150] sm:$0xff]  ;;  %v3610_v1 = vld [vmem:[%s4028_s2 + $0x60] sm:$0xff] }
 0x2ff   :  { %2496 = vtanh.f32 %v885_v20  ;;  %v3596_v20 = vld [vmem:[%s4028_s2 + $0x78] sm:$0xff] }
 0x30c   :  { %v2497_v21 = vpop.eup %2496 }
 0x30d   :  { %v888_v27 = vmul.f32 %v2497_v21, %v887_v25  ;;  %v3624_v25 = vld [vmem:[%s4028_s2 + $0x48] sm:$0xff]  ;;  %v3638_v21 = vld [vmem:[%s4028_s2 + $0x30] sm:$0xff] }
 0x30f   :  { %v3360_v17 = vadd.f32 %v889_v3, %v888_v27  ;;  %v3652_v27 = vld [vmem:[%s4028_s2 + $0x18] sm:$0xff]  ;;  %v3666_v3 = vld [vmem:[%s4028_s2] sm:$0xff] }
 0x310   :  { %4111 = vst [vmem:[#allocation4_spill] sm:$0xff] %v3666_v3 }
 0x311   :  { %4101 = vst [vmem:[#allocation16_spill] sm:$0xff] %v3360_v17  ;;  %1939 = vst [vmem:[%s4031_s7 + $0x10] sm:$0xff] %v3360_v17  ;;  %964 = vmatmul.mubr.f32.vlgmr.msra.gmra.mxu0 %v3360_v17  ;;  %2280 = vmatmul.mubr.f32.vlgmr.msra.gmra.mxu1 %v3360_v17 }
 0x312   :  { %1071 = vmatpush1.msra.mxu0 %v2669_v6  ;;  %2283 = vmatpush3.msra.mxu1 %v2930_v47  ;;  %v4102_v6 = vld [vmem:[#allocation7_spill] sm:$0xff] }
 0x313   :  { %1072 = vmatprep.subr.mxu0 %v2674_v7  ;;  %2284 = vmatprep.subr.mxu1 %v4083_v4  ;;  %v4103_v7 = vld [vmem:[#allocation5_spill] sm:$0xff] }
 0x314   :  { %1073 = vmatpush1.msra.mxu0 %v2682_v8  ;;  %2285 = vmatpush3.msra.mxu1 %v2941_v48  ;;  %v4104_v8 = vld [vmem:[#allocation6_spill] sm:$0xff] }
 0x315   :  { %1074 = vmatprep.subr.mxu0 %v2688_v9  ;;  %2286 = vmatprep.subr.mxu1 %v4083_v4  ;;  %v4105_v9 = vld [vmem:[#allocation8_spill] sm:$0xff] }
 0x316   :  { %1075 = vmatpush1.msra.mxu0 %v2694_v10  ;;  %2287 = vmatpush3.msra.mxu1 %v2950_v49  ;;  %v3436_v10 = vld [vmem:[%s4028_s2 + $0x170] sm:$0xff] }
 0x317   :  { %1076 = vmatprep.subr.mxu0 %v2710_v13  ;;  %2288 = vmatprep.subr.mxu1 %v4083_v4 }
 0x318   :  { %1077 = vmatpush1.msra.mxu0 %v2718_v14  ;;  %2289 = vmatpush3.msra.mxu1 %v2959_v50 }
 0x319   :  { %1078 = vmatprep.subr.mxu0 %v2731_v16  ;;  %2290 = vmatprep.subr.mxu1 %v4083_v4  ;;  %v4106_v16 = vld [vmem:[#allocation21_spill] sm:$0xff] }
 0x31a   :  { %1079 = vmatpush1.msra.mxu0 %v2747_v19  ;;  %2291 = vmatpush3.msra.mxu1 %v2968_v51 }
 0x31b   :  { %1080 = vmatprep.subr.mxu0 %v2761_v22  ;;  %2292 = vmatprep.subr.mxu1 %v4083_v4 }
 0x31c   :  { %1081 = vmatpush1.msra.mxu0 %v2770_v24  ;;  %2293 = vmatpush3.msra.mxu1 %v2978_v52 }
 0x31d   :  { %1082 = vmatprep.subr.mxu0 %v2781_v26  ;;  %2294 = vmatprep.subr.mxu1 %v4083_v4 }
 0x31e   :  { %1083 = vmatpush1.msra.mxu0 %v2794_v28  ;;  %2295 = vmatpush3.msra.mxu1 %v2987_v53  ;;  %v4107_v28 = vld [vmem:[#allocation22_spill] sm:$0xff] }
 0x31f   :  { %1084 = vmatprep.subr.mxu0 %v2800_v29  ;;  %2296 = vmatprep.subr.mxu1 %v4083_v4 }
 0x320   :  { %1085 = vmatpush1.msra.mxu0 %v2806_v30  ;;  %2297 = vmatpush3.msra.mxu1 %v2996_v54 }
 0x321   :  { %1086 = vmatprep.subr.mxu0 %v2814_v31  ;;  %2298 = vmatprep.subr.mxu1 %v4083_v4 }
 0x322   :  { %1087 = vmatpush1.msra.mxu0 %v2821_v32  ;;  %2299 = vmatpush3.msra.mxu1 %v3006_v55 }
 0x323   :  { %1088 = vmatprep.subr.mxu0 %v2828_v33  ;;  %2300 = vmatprep.subr.mxu1 %v4083_v4 }
 0x324   :  { %1089 = vmatpush1.msra.mxu0 %v2835_v34  ;;  %2301 = vmatpush3.msra.mxu1 %v3015_v56 }
 0x325   :  { %1090 = vmatprep.subr.mxu0 %v2842_v35  ;;  %2302 = vmatprep.subr.mxu1 %v4083_v4 }
 0x326   :  { %1091 = vmatpush1.msra.mxu0 %v2849_v36  ;;  %2303 = vmatpush3.msra.mxu1 %v3024_v57 }
 0x327   :  { %1092 = vmatprep.subr.mxu0 %v2856_v37  ;;  %2304 = vmatprep.subr.mxu1 %v4083_v4 }
 0x328   :  { %1093 = vmatpush1.msra.mxu0 %v2864_v38  ;;  %2305 = vmatpush3.msra.mxu1 %v3034_v58  ;;  %v4108_v38 = vld [vmem:[#allocation10_spill] sm:$0xff] }
 0x329   :  { %1094 = vmatprep.subr.mxu0 %v2871_v39  ;;  %2306 = vmatprep.subr.mxu1 %v4083_v4 }
 0x32a   :  { %1095 = vmatpush1.msra.mxu0 %v2878_v40  ;;  %2307 = vmatpush3.msra.mxu1 %v3043_v59 }
 0x32b   :  { %1096 = vmatprep.subr.mxu0 %v2885_v41  ;;  %2308 = vmatprep.subr.mxu1 %v4083_v4 }
 0x32c   :  { %1097 = vmatpush1.msra.mxu0 %v2892_v42  ;;  %2309 = vmatpush3.msra.mxu1 %v3052_v60 }
 0x32d   :  { %1098 = vmatprep.subr.mxu0 %v2899_v43  ;;  %2310 = vmatprep.subr.mxu1 %v4083_v4 }
 0x32e   :  { %1099 = vmatpush1.msra.mxu0 %v4092_v44  ;;  %2311 = vmatpush3.msra.mxu1 %v4102_v6  ;;  %v3456_v44 = vld [vmem:[%s4028_s2 + $0x168] sm:$0xff] }
 0x32f   :  { %1100 = vmatprep.subr.mxu0 %v4103_v7  ;;  %2312 = vmatprep.subr.mxu1 %v4083_v4 }
 0x330   :  { %1101 = vmatpush1.msra.mxu0 %v4104_v8  ;;  %1134 = vmatprep.mubr.f32.mxu0 %v4083_v4  ;;  %v4112_v8 = vld [vmem:[#allocation23_spill] sm:$0xff] }
 0x331   :  { %2313 = vmatpush3.msra.mxu1 %v4105_v9  ;;  %2314 = vmatprep.mubr.msk.f32.mxu1 %vm2599_vm1, %v4083_v4 }
 0x332   :  { %1241 = vmatprep.subr.mxu0 %v3436_v10  ;;  %2317 = vmatprep.subr.mxu1 %v4083_v4 }
 0x3d1   :  { %v965_v13 = vpop.f32.mrf.mxu0  ;;  %v1036_v14 = vpop.f32.mrf.mxu1 }
 0x3d2   :  { %v1040_v19 = vadd.f32 %v965_v13, %v4106_v16  ;;  %v1054_v35 = vadd.f32 %v3191_v0, %v1036_v14 }
 0x3d3   :  { %v2281_v22 = vpop.f32.mrf.mxu1  ;;  %v967_v26 = vpop.f32.mrf.mxu0 }
 0x3d4   :  { %v1940_v24 = vmul.f32 -1.442695, %v1040_v19  ;;  %v1041_v29 = vadd.f32 %v967_v26, %v4107_v28  ;;  %v4113_v22 = vld [vmem:[#allocation24_spill] sm:$0xff] }
 0x3d6   :  { %2498 = vpow2.f32 %v1940_v24  ;;  %v1941_v30 = vmul.f32 -1.442695, %v1041_v29 }
 0x3d8   :  { %2500 = vpow2.f32 %v1941_v30 }
 0x3e3   :  { %v2499_v31 = vpop.eup %2498 }
 0x3e4   :  { %v1048_v32 = vadd.f32 1.0, %v2499_v31 }
 0x3e5   :  { %v2501_v33 = vpop.eup %2500 }
 0x3e6   :  { %2502 = vrcp.f32 %v1048_v32  ;;  %v1049_v34 = vadd.f32 1.0, %v2501_v33 }
 0x3e8   :  { %2504 = vrcp.f32 %v1049_v34  ;;  %v4114_v34 = vld [vmem:[#allocation13_spill] sm:$0xff] }
 0x3f3   :  { %v2503_v36 = vpop.eup %2502 }
 0x3f4   :  { %v1055_v37 = vmul.f32 %v2503_v36, %v1054_v35 }
 0x3f5   :  { %v2505_v40 = vpop.eup %2504 }
 0x3f6   :  { %v1056_v39 = vadd.f32 %v1055_v37, %v4108_v38  ;;  %v1058_v41 = vsub.f32 1.0, %v2505_v40  ;;  %v1060_v63 = vmul.f32 %v2505_v40, %v3360_v17 }
 0x3f8   :  { %2506 = vtanh.f32 %v1056_v39 }
 0x405   :  { %v2507_v42 = vpop.eup %2506 }
 0x406   :  { %v1059_v43 = vmul.f32 %v2507_v42, %v1058_v41  ;;  %v3692_v42 = vld [vmem:[%s4028_s2 + $0x178] sm:$0xff] }
 0x408   :  { %v3445_v45 = vadd.f32 %v1060_v63, %v1059_v43  ;;  %v3701_v43 = vld [vmem:[%s4028_s2 + $0x160] sm:$0xff]  ;;  %v3710_v63 = vld [vmem:[%s4028_s2 + $0x148] sm:$0xff] }
 0x40a   :  { %4109 = vst [vmem:[#allocation17_spill] sm:$0xff] %v3445_v45  ;;  %1942 = vst [vmem:[%s4031_s7 + $0x18] sm:$0xff] %v3445_v45  ;;  %1135 = vmatmul.mubr.f32.vlgmr.msra.gmra.mxu0 %v3445_v45  ;;  %2315 = vmatmul.mubr.f32.vlgmr.msra.gmra.mxu1 %v3445_v45 }
 0x40b   :  { %1242 = vmatpush1.msra.mxu0 %v3456_v44  ;;  %2318 = vmatpush3.msra.mxu1 %v2930_v47  ;;  %v3477_v47 = vld [vmem:[%s4028_s2 + $0x140] sm:$0xff] }
 0x40c   :  { %1243 = vmatprep.subr.mxu0 %v3463_v46  ;;  %2319 = vmatprep.subr.mxu1 %v4083_v4 }
 0x40d   :  { %1244 = vmatpush1.msra.mxu0 %v3470_v61  ;;  %2320 = vmatpush3.msra.mxu1 %v2941_v48  ;;  %v3491_v48 = vld [vmem:[%s4028_s2 + $0x128] sm:$0xff] }
 0x40e   :  { %1245 = vmatprep.subr.mxu0 %v3477_v47  ;;  %2321 = vmatprep.subr.mxu1 %v4083_v4 }
 0x40f   :  { %1246 = vmatpush1.msra.mxu0 %v3484_v5  ;;  %2322 = vmatpush3.msra.mxu1 %v2950_v49  ;;  %v3505_v49 = vld [vmem:[%s4028_s2 + $0x110] sm:$0xff] }
 0x410   :  { %1247 = vmatprep.subr.mxu0 %v3491_v48  ;;  %2323 = vmatprep.subr.mxu1 %v4083_v4 }
 0x411   :  { %1248 = vmatpush1.msra.mxu0 %v3498_v15  ;;  %2324 = vmatpush3.msra.mxu1 %v2959_v50  ;;  %v3519_v50 = vld [vmem:[%s4028_s2 + $0xf8] sm:$0xff] }
 0x412   :  { %1249 = vmatprep.subr.mxu0 %v3505_v49  ;;  %2325 = vmatprep.subr.mxu1 %v4083_v4 }
 0x413   :  { %1250 = vmatpush1.msra.mxu0 %v3512_v2  ;;  %2326 = vmatpush3.msra.mxu1 %v2968_v51  ;;  %v3533_v51 = vld [vmem:[%s4028_s2 + $0xe0] sm:$0xff] }
 0x414   :  { %1251 = vmatprep.subr.mxu0 %v3519_v50  ;;  %2327 = vmatprep.subr.mxu1 %v4083_v4 }
 0x415   :  { %1252 = vmatpush1.msra.mxu0 %v3526_v18  ;;  %2328 = vmatpush3.msra.mxu1 %v2978_v52  ;;  %v3547_v52 = vld [vmem:[%s4028_s2 + $0xc8] sm:$0xff] }
 0x416   :  { %1253 = vmatprep.subr.mxu0 %v3533_v51  ;;  %2329 = vmatprep.subr.mxu1 %v4083_v4 }
 0x417   :  { %1254 = vmatpush1.msra.mxu0 %v3540_v11  ;;  %2330 = vmatpush3.msra.mxu1 %v2987_v53  ;;  %v3561_v53 = vld [vmem:[%s4028_s2 + $0xb0] sm:$0xff] }
 0x418   :  { %1255 = vmatprep.subr.mxu0 %v3547_v52  ;;  %2331 = vmatprep.subr.mxu1 %v4083_v4 }
 0x419   :  { %1256 = vmatpush1.msra.mxu0 %v3554_v23  ;;  %2332 = vmatpush3.msra.mxu1 %v2996_v54  ;;  %v3575_v54 = vld [vmem:[%s4028_s2 + $0x98] sm:$0xff] }
 0x41a   :  { %1257 = vmatprep.subr.mxu0 %v3561_v53  ;;  %2333 = vmatprep.subr.mxu1 %v4083_v4 }
 0x41b   :  { %1258 = vmatpush1.msra.mxu0 %v3568_v62  ;;  %2334 = vmatpush3.msra.mxu1 %v3006_v55  ;;  %v3589_v55 = vld [vmem:[%s4028_s2 + $0x80] sm:$0xff] }
 0x41c   :  { %1259 = vmatprep.subr.mxu0 %v3575_v54  ;;  %2335 = vmatprep.subr.mxu1 %v4083_v4 }
 0x41d   :  { %1260 = vmatpush1.msra.mxu0 %v3582_v12  ;;  %2336 = vmatpush3.msra.mxu1 %v3015_v56  ;;  %v3603_v56 = vld [vmem:[%s4028_s2 + $0x68] sm:$0xff] }
 0x41e   :  { %1261 = vmatprep.subr.mxu0 %v3589_v55  ;;  %2337 = vmatprep.subr.mxu1 %v4083_v4 }
 0x41f   :  { %1262 = vmatpush1.msra.mxu0 %v3596_v20  ;;  %2338 = vmatpush3.msra.mxu1 %v3024_v57  ;;  %v3617_v57 = vld [vmem:[%s4028_s2 + $0x50] sm:$0xff] }
 0x420   :  { %1263 = vmatprep.subr.mxu0 %v3603_v56  ;;  %2339 = vmatprep.subr.mxu1 %v4083_v4 }
 0x421   :  { %1264 = vmatpush1.msra.mxu0 %v3610_v1  ;;  %2340 = vmatpush3.msra.mxu1 %v3034_v58  ;;  %v3631_v58 = vld [vmem:[%s4028_s2 + $0x38] sm:$0xff] }
 0x422   :  { %1265 = vmatprep.subr.mxu0 %v3617_v57  ;;  %2341 = vmatprep.subr.mxu1 %v4083_v4 }
 0x423   :  { %1266 = vmatpush1.msra.mxu0 %v3624_v25  ;;  %2342 = vmatpush3.msra.mxu1 %v3043_v59  ;;  %v3645_v59 = vld [vmem:[%s4028_s2 + $0x20] sm:$0xff] }
 0x424   :  { %1267 = vmatprep.subr.mxu0 %v3631_v58  ;;  %2343 = vmatprep.subr.mxu1 %v4083_v4 }
 0x425   :  { %1268 = vmatpush1.msra.mxu0 %v3638_v21  ;;  %2344 = vmatpush3.msra.mxu1 %v3052_v60  ;;  %v3659_v60 = vld [vmem:[%s4028_s2 + $0x8] sm:$0xff] }
 0x426   :  { %1269 = vmatprep.subr.mxu0 %v3645_v59  ;;  %2345 = vmatprep.subr.mxu1 %v4083_v4  ;;  %4110 = vst [vmem:[#allocation9_spill] sm:$0xff] %v3659_v60 }
 0x427   :  { %1270 = vmatpush1.msra.mxu0 %v3652_v27  ;;  %2346 = vmatpush3.msra.mxu1 %v4102_v6 }
 0x428   :  { %1271 = vmatprep.subr.mxu0 %v3659_v60  ;;  %2347 = vmatprep.subr.mxu1 %v4083_v4 }
 0x429   :  { %1272 = vmatpush1.msra.mxu0 %v3666_v3  ;;  %1305 = vmatprep.mubr.f32.mxu0 %v4083_v4 }
 0x42a   :  { %2348 = vmatpush3.msra.mxu1 %v4105_v9  ;;  %2349 = vmatprep.mubr.msk.f32.mxu1 %vm2599_vm1, %v4083_v4 }
 0x42b   :  { %1412 = vmatprep.subr.mxu0 %v3436_v10  ;;  %2352 = vmatprep.subr.mxu1 %v4083_v4 }
 0x4ca   :  { %v1136_v6 = vpop.f32.mrf.mxu0  ;;  %v1207_v7 = vpop.f32.mrf.mxu1 }
 0x4cb   :  { %v1211_v13 = vadd.f32 %v1136_v6, %v4112_v8  ;;  %v1225_v31 = vadd.f32 %v3191_v0, %v1207_v7  ;;  %v3719_v6 = vld [vmem:[%s4028_s2 + $0x130] sm:$0xff]  ;;  %v3728_v7 = vld [vmem:[%s4028_s2 + $0x118] sm:$0xff]  ;;  %v3737_v8 = vld [vmem:[%s4028_s2 + $0x100] sm:$0xff] }
 0x4cc   :  { %v2316_v14 = vpop.f32.mrf.mxu1  ;;  %v1138_v19 = vpop.f32.mrf.mxu0 }
 0x4cd   :  { %v1943_v16 = vmul.f32 -1.442695, %v1211_v13  ;;  %v1212_v24 = vadd.f32 %v1138_v19, %v4113_v22  ;;  %v3746_v13 = vld [vmem:[%s4028_s2 + $0xe8] sm:$0xff]  ;;  %v3755_v14 = vld [vmem:[%s4028_s2 + $0xd0] sm:$0xff]  ;;  %v3773_v19 = vld [vmem:[%s4028_s2 + $0xa0] sm:$0xff] }
 0x4ce   :  { %v3782_v22 = vld [vmem:[%s4028_s2 + $0x88] sm:$0xff] }
 0x4cf   :  { %2508 = vpow2.f32 %v1943_v16  ;;  %v1944_v26 = vmul.f32 -1.442695, %v1212_v24  ;;  %v3764_v16 = vld [vmem:[%s4028_s2 + $0xb8] sm:$0xff]  ;;  %v3791_v24 = vld [vmem:[%s4028_s2 + $0x70] sm:$0xff] }
 0x4d1   :  { %2510 = vpow2.f32 %v1944_v26  ;;  %v3800_v26 = vld [vmem:[%s4028_s2 + $0x58] sm:$0xff] }
 0x4dc   :  { %v2509_v9 = vpop.eup %2508 }
 0x4dd   :  { %v1219_v28 = vadd.f32 1.0, %v2509_v9  ;;  %v3809_v9 = vld [vmem:[%s4028_s2 + $0x40] sm:$0xff] }
 0x4de   :  { %v2511_v29 = vpop.eup %2510 }
 0x4df   :  { %2512 = vrcp.f32 %v1219_v28  ;;  %v1220_v30 = vadd.f32 1.0, %v2511_v29  ;;  %v3818_v28 = vld [vmem:[%s4028_s2 + $0x28] sm:$0xff]  ;;  %v3828_v29 = vld [vmem:[%s4028_s2 + $0x10] sm:$0xff] }
 0x4e0   :  { %4115 = vst [vmem:[#allocation3_spill] sm:$0xff] %v3818_v28  ;;  %4116 = vst [vmem:[#allocation19_spill] sm:$0xff] %v3828_v29 }
 0x4e1   :  { %2514 = vrcp.f32 %v1220_v30 }
 0x4ec   :  { %v2513_v32 = vpop.eup %2512 }
 0x4ed   :  { %v1226_v33 = vmul.f32 %v2513_v32, %v1225_v31  ;;  %v4117_v32 = vld [vmem:[#allocation25_spill] sm:$0xff] }
 0x4ee   :  { %v2515_v36 = vpop.eup %2514 }
 0x4ef   :  { %v1227_v35 = vadd.f32 %v1226_v33, %v4114_v34  ;;  %v1229_v37 = vsub.f32 1.0, %v2515_v36  ;;  %v1231_v40 = vmul.f32 %v2515_v36, %v3445_v45 }
 0x4f1   :  { %2516 = vtanh.f32 %v1227_v35 }
 0x4fe   :  { %v2517_v38 = vpop.eup %2516 }
 0x4ff   :  { %v1230_v39 = vmul.f32 %v2517_v38, %v1229_v37  ;;  %v4118_v37 = vld [vmem:[#allocation26_spill] sm:$0xff] }
 0x501   :  { %v3680_v41 = vadd.f32 %v1231_v40, %v1230_v39 }
 0x503   :  { %1945 = vst [vmem:[%s4031_s7 + $0x20] sm:$0xff] %v3680_v41  ;;  %1306 = vmatmul.mubr.f32.vlgmr.msra.gmra.mxu0 %v3680_v41  ;;  %2350 = vmatmul.mubr.f32.vlgmr.msra.gmra.mxu1 %v3680_v41 }
 0x504   :  { %1413 = vmatpush1.msra.mxu0 %v3456_v44  ;;  %2353 = vmatpush3.msra.mxu1 %v3692_v42 }
 0x505   :  { %1414 = vmatprep.subr.mxu0 %v3463_v46  ;;  %2354 = vmatprep.subr.mxu1 %v4083_v4 }
 0x506   :  { %1415 = vmatpush1.msra.mxu0 %v3470_v61  ;;  %2355 = vmatpush3.msra.mxu1 %v3701_v43 }
 0x507   :  { %1416 = vmatprep.subr.mxu0 %v3477_v47  ;;  %2356 = vmatprep.subr.mxu1 %v4083_v4 }
 0x508   :  { %1417 = vmatpush1.msra.mxu0 %v3484_v5  ;;  %2357 = vmatpush3.msra.mxu1 %v3710_v63 }
 0x509   :  { %1418 = vmatprep.subr.mxu0 %v3491_v48  ;;  %2358 = vmatprep.subr.mxu1 %v4083_v4 }
 0x50a   :  { %1419 = vmatpush1.msra.mxu0 %v3498_v15  ;;  %2359 = vmatpush3.msra.mxu1 %v3719_v6 }
 0x50b   :  { %1420 = vmatprep.subr.mxu0 %v3505_v49  ;;  %2360 = vmatprep.subr.mxu1 %v4083_v4 }
 0x50c   :  { %1421 = vmatpush1.msra.mxu0 %v3512_v2  ;;  %2361 = vmatpush3.msra.mxu1 %v3728_v7 }
 0x50d   :  { %1422 = vmatprep.subr.mxu0 %v3519_v50  ;;  %2362 = vmatprep.subr.mxu1 %v4083_v4 }
 0x50e   :  { %1423 = vmatpush1.msra.mxu0 %v3526_v18  ;;  %2363 = vmatpush3.msra.mxu1 %v3737_v8 }
 0x50f   :  { %1424 = vmatprep.subr.mxu0 %v3533_v51  ;;  %2364 = vmatprep.subr.mxu1 %v4083_v4 }
 0x510   :  { %1425 = vmatpush1.msra.mxu0 %v3540_v11  ;;  %2365 = vmatpush3.msra.mxu1 %v3746_v13 }
 0x511   :  { %1426 = vmatprep.subr.mxu0 %v3547_v52  ;;  %2366 = vmatprep.subr.mxu1 %v4083_v4 }
 0x512   :  { %1427 = vmatpush1.msra.mxu0 %v3554_v23  ;;  %2367 = vmatpush3.msra.mxu1 %v3755_v14 }
 0x513   :  { %1428 = vmatprep.subr.mxu0 %v3561_v53  ;;  %2368 = vmatprep.subr.mxu1 %v4083_v4 }
 0x514   :  { %1429 = vmatpush1.msra.mxu0 %v3568_v62  ;;  %2369 = vmatpush3.msra.mxu1 %v3764_v16 }
 0x515   :  { %1430 = vmatprep.subr.mxu0 %v3575_v54  ;;  %2370 = vmatprep.subr.mxu1 %v4083_v4 }
 0x516   :  { %1431 = vmatpush1.msra.mxu0 %v3582_v12  ;;  %2371 = vmatpush3.msra.mxu1 %v3773_v19 }
 0x517   :  { %1432 = vmatprep.subr.mxu0 %v3589_v55  ;;  %2372 = vmatprep.subr.mxu1 %v4083_v4 }
 0x518   :  { %1433 = vmatpush1.msra.mxu0 %v3596_v20  ;;  %2373 = vmatpush3.msra.mxu1 %v3782_v22 }
 0x519   :  { %1434 = vmatprep.subr.mxu0 %v3603_v56  ;;  %2374 = vmatprep.subr.mxu1 %v4083_v4 }
 0x51a   :  { %1435 = vmatpush1.msra.mxu0 %v3610_v1  ;;  %2375 = vmatpush3.msra.mxu1 %v3791_v24 }
 0x51b   :  { %1436 = vmatprep.subr.mxu0 %v3617_v57  ;;  %2376 = vmatprep.subr.mxu1 %v4083_v4 }
 0x51c   :  { %1437 = vmatpush1.msra.mxu0 %v3624_v25  ;;  %2377 = vmatpush3.msra.mxu1 %v3800_v26 }
 0x51d   :  { %1438 = vmatprep.subr.mxu0 %v3631_v58  ;;  %2378 = vmatprep.subr.mxu1 %v4083_v4 }
 0x51e   :  { %1439 = vmatpush1.msra.mxu0 %v3638_v21  ;;  %2379 = vmatpush3.msra.mxu1 %v3809_v9 }
 0x51f   :  { %1440 = vmatprep.subr.mxu0 %v3645_v59  ;;  %2380 = vmatprep.subr.mxu1 %v4083_v4 }
 0x520   :  { %1441 = vmatpush1.msra.mxu0 %v3652_v27  ;;  %2381 = vmatpush3.msra.mxu1 %v3818_v28  ;;  %v4119_v28 = vld [vmem:[#allocation12_spill] sm:$0xff] }
 0x521   :  { %1442 = vmatprep.subr.mxu0 %v3659_v60  ;;  %2382 = vmatprep.subr.mxu1 %v4083_v4 }
 0x522   :  { %1443 = vmatpush1.msra.mxu0 %v3666_v3  ;;  %1476 = vmatprep.mubr.f32.mxu0 %v4083_v4 }
 0x523   :  { %2383 = vmatpush3.msra.mxu1 %v3828_v29  ;;  %2384 = vmatprep.mubr.msk.f32.mxu1 %vm2599_vm1, %v4083_v4 }
 0x524   :  { %1583 = vmatprep.subr.mxu0 %v3436_v10  ;;  %2387 = vmatprep.subr.mxu1 %v4083_v4 }
 0x5c3   :  { %v1307_v30 = vpop.f32.mrf.mxu0  ;;  %v1378_v31 = vpop.f32.mrf.mxu1 }
 0x5c4   :  { %v1382_v33 = vadd.f32 %v1307_v30, %v4117_v32  ;;  %v1396_v10 = vadd.f32 %v3191_v0, %v1378_v31  ;;  %v4120_v0 = vld [vmem:[#allocation3_spill] sm:$0xff] }
 0x5c5   :  { %v2351_v34 = vpop.f32.mrf.mxu1  ;;  %v1309_v36 = vpop.f32.mrf.mxu0 }
 0x5c6   :  { %v1946_v35 = vmul.f32 -1.442695, %v1382_v33  ;;  %v1383_v38 = vadd.f32 %v1309_v36, %v4118_v37 }
 0x5c8   :  { %2518 = vpow2.f32 %v1946_v35  ;;  %v1947_v39 = vmul.f32 -1.442695, %v1383_v38  ;;  %v4128_v38 = vld [vmem:[#allocation17_spill] sm:$0xff] }
 0x5ca   :  { %2520 = vpow2.f32 %v1947_v39  ;;  %v1759_v39 = vmax.f32 %v4128_v38, 0.0 }
 0x5d5   :  { %v2519_v40 = vpop.eup %2518 }
 0x5d6   :  { %v1390_v45 = vadd.f32 1.0, %v2519_v40  ;;  %v1760_v40 = vmax.f32 %v3680_v41, 0.0 }
 0x5d7   :  { %v2521_v17 = vpop.eup %2520 }
 0x5d8   :  { %2522 = vrcp.f32 %v1390_v45  ;;  %v1391_v29 = vadd.f32 1.0, %v2521_v17  ;;  %v4121_v17 = vld [vmem:[#allocation9_spill] sm:$0xff]  ;;  %v4122_v45 = vld [vmem:[#allocation4_spill] sm:$0xff] }
 0x5da   :  { %2524 = vrcp.f32 %v1391_v29  ;;  %v4127_v29 = vld [vmem:[#allocation16_spill] sm:$0xff] }
 0x5db   :  { %v1758_v31 = vmax.f32 %v4127_v29, 0.0 }
 0x5e5   :  { %v2523_v3 = vpop.eup %2522 }
 0x5e6   :  { %v1397_v60 = vmul.f32 %v2523_v3, %v1396_v10  ;;  %v1777_v3 = vld [vmem:[%s4032_s5 + $0x68] sm:$0xff] }
 0x5e7   :  { %v2525_v32 = vpop.eup %2524 }
 0x5e8   :  { %v1398_v30 = vadd.f32 %v1397_v60, %v4119_v28  ;;  %v1400_v33 = vsub.f32 1.0, %v2525_v32  ;;  %v1402_v36 = vmul.f32 %v2525_v32, %v3680_v41 }
 0x5ea   :  { %2526 = vtanh.f32 %v1398_v30 }
 0x5f7   :  { %v2527_v34 = vpop.eup %2526 }
 0x5f8   :  { %v1401_v35 = vmul.f32 %v2527_v34, %v1400_v33  ;;  %v4129_v34 = vld [vmem:[#allocation29_spill] sm:$0xff] }
 0x5fa   :  { %v3840_v37 = vadd.f32 %v1402_v36, %v1401_v35 }
 0x5fc   :  { %1948 = vst [vmem:[%s4031_s7 + $0x28] sm:$0xff] %v3840_v37  ;;  %1477 = vmatmul.mubr.f32.vlgmr.msra.gmra.mxu0 %v3840_v37  ;;  %2385 = vmatmul.mubr.f32.vlgmr.msra.gmra.mxu1 %v3840_v37  ;;  %v1761_v10 = vmax.f32 %v3840_v37, 0.0 }
 0x5fd   :  { %1584 = vmatpush1.msra.mxu0 %v3456_v44  ;;  %2388 = vmatpush3.msra.mxu1 %v3692_v42  ;;  %v4123_v44 = vld [vmem:[#allocation19_spill] sm:$0xff] }
 0x5fe   :  { %1585 = vmatprep.subr.mxu0 %v3463_v46  ;;  %2389 = vmatprep.subr.mxu1 %v4083_v4  ;;  %v1779_v46 = vld [vmem:[%s4032_s5 + $0x78] sm:$0xff]  ;;  %v1776_v42 = vld [vmem:[%s4032_s5 + $0x60] sm:$0xff] }
 0x5ff   :  { %1586 = vmatpush1.msra.mxu0 %v3470_v61  ;;  %2390 = vmatpush3.msra.mxu1 %v3701_v43  ;;  %v1775_v43 = vld [vmem:[%s4032_s5 + $0x58] sm:$0xff] }
 0x600   :  { %1587 = vmatprep.subr.mxu0 %v3477_v47  ;;  %2391 = vmatprep.subr.mxu1 %v4083_v4 }
 0x601   :  { %1588 = vmatpush1.msra.mxu0 %v3484_v5  ;;  %2392 = vmatpush3.msra.mxu1 %v3710_v63  ;;  %v4124_v5 = vld [vmem:[#allocation27_spill] sm:$0xff]  ;;  %v1774_v63 = vld [vmem:[%s4032_s5 + $0x50] sm:$0xff] }
 0x602   :  { %1589 = vmatprep.subr.mxu0 %v3491_v48  ;;  %2393 = vmatprep.subr.mxu1 %v4083_v4 }
 0x603   :  { %1590 = vmatpush1.msra.mxu0 %v3498_v15  ;;  %2394 = vmatpush3.msra.mxu1 %v3719_v6  ;;  %v1773_v6 = vld [vmem:[%s4032_s5 + $0x48] sm:$0xff] }
 0x604   :  { %1591 = vmatprep.subr.mxu0 %v3505_v49  ;;  %2395 = vmatprep.subr.mxu1 %v4083_v4 }
 0x605   :  { %1592 = vmatpush1.msra.mxu0 %v3512_v2  ;;  %2396 = vmatpush3.msra.mxu1 %v3728_v7  ;;  %v1772_v7 = vld [vmem:[%s4032_s5 + $0x40] sm:$0xff] }
 0x606   :  { %1593 = vmatprep.subr.mxu0 %v3519_v50  ;;  %2397 = vmatprep.subr.mxu1 %v4083_v4  ;;  %v4125_v50 = vld [vmem:[#allocation28_spill] sm:$0xff] }
 0x607   :  { %1594 = vmatpush1.msra.mxu0 %v3526_v18  ;;  %2398 = vmatpush3.msra.mxu1 %v3737_v8  ;;  %v1771_v8 = vld [vmem:[%s4032_s5 + $0x38] sm:$0xff] }
 0x608   :  { %1595 = vmatprep.subr.mxu0 %v3533_v51  ;;  %2399 = vmatprep.subr.mxu1 %v4083_v4 }
 0x609   :  { %1596 = vmatpush1.msra.mxu0 %v3540_v11  ;;  %2400 = vmatpush3.msra.mxu1 %v3746_v13  ;;  %v1770_v13 = vld [vmem:[%s4032_s5 + $0x30] sm:$0xff] }
 0x60a   :  { %1597 = vmatprep.subr.mxu0 %v3547_v52  ;;  %2401 = vmatprep.subr.mxu1 %v4083_v4 }
 0x60b   :  { %1598 = vmatpush1.msra.mxu0 %v3554_v23  ;;  %2402 = vmatpush3.msra.mxu1 %v3755_v14  ;;  %v1769_v14 = vld [vmem:[%s4032_s5 + $0x28] sm:$0xff] }
 0x60c   :  { %1599 = vmatprep.subr.mxu0 %v3561_v53  ;;  %2403 = vmatprep.subr.mxu1 %v4083_v4  ;;  %v3921_v53 = vld [vmem:[%s4030_s4] ss:$0 sm:$0xff] }
 0x60d   :  { %1600 = vmatpush1.msra.mxu0 %v3568_v62  ;;  %2404 = vmatpush3.msra.mxu1 %v3764_v16  ;;  %v1768_v16 = vld [vmem:[%s4032_s5 + $0x20] sm:$0xff] }
 0x60e   :  { %1601 = vmatprep.subr.mxu0 %v3575_v54  ;;  %2405 = vmatprep.subr.mxu1 %v4083_v4 }
 0x60f   :  { %1602 = vmatpush1.msra.mxu0 %v3582_v12  ;;  %2406 = vmatpush3.msra.mxu1 %v3773_v19  ;;  %v1767_v19 = vld [vmem:[%s4032_s5 + $0x18] sm:$0xff] }
 0x610   :  { %1603 = vmatprep.subr.mxu0 %v3589_v55  ;;  %2407 = vmatprep.subr.mxu1 %v4083_v4  ;;  %v4126_v55 = vld [vmem:[#allocation15_spill] sm:$0xff] }
 0x611   :  { %1604 = vmatpush1.msra.mxu0 %v3596_v20  ;;  %2408 = vmatpush3.msra.mxu1 %v3782_v22  ;;  %v1766_v22 = vld [vmem:[%s4032_s5 + $0x10] sm:$0xff] }
 0x612   :  { %1605 = vmatprep.subr.mxu0 %v3603_v56  ;;  %2409 = vmatprep.subr.mxu1 %v4083_v4 }
 0x613   :  { %1606 = vmatpush1.msra.mxu0 %v3610_v1  ;;  %2410 = vmatpush3.msra.mxu1 %v3791_v24  ;;  %v1765_v24 = vld [vmem:[%s4032_s5 + $0x8] sm:$0xff] }
 0x614   :  { %1607 = vmatprep.subr.mxu0 %v3617_v57  ;;  %2411 = vmatprep.subr.mxu1 %v4083_v4 }
 0x615   :  { %1608 = vmatpush1.msra.mxu0 %v3624_v25  ;;  %2412 = vmatpush3.msra.mxu1 %v3800_v26  ;;  %v1764_v26 = vld [vmem:[%s4032_s5] sm:$0xff] }
 0x616   :  { %1609 = vmatprep.subr.mxu0 %v3631_v58  ;;  %2413 = vmatprep.subr.mxu1 %v4083_v4 }
 0x617   :  { %1610 = vmatpush1.msra.mxu0 %v3638_v21  ;;  %2414 = vmatpush3.msra.mxu1 %v3809_v9  ;;  %v1748_v21 = vld [vmem:[%s4031_s7] sm:$0xff]  ;;  %v2597_v9 = vld [vmem:[%s4031_s7 + $0x8] sm:$0xff] }
 0x618   :  { %1611 = vmatprep.subr.mxu0 %v3645_v59  ;;  %2415 = vmatprep.subr.mxu1 %v4083_v4  ;;  %v1756_v60 = vmax.f32 %v1748_v21, 0.0  ;;  %v1757_v28 = vmax.f32 %v2597_v9, 0.0 }
 0x619   :  { %1612 = vmatpush1.msra.mxu0 %v3652_v27  ;;  %2416 = vmatpush3.msra.mxu1 %v4120_v0  ;;  %v1778_v27 = vld [vmem:[%s4032_s5 + $0x70] sm:$0xff] }
 0x61a   :  { %1613 = vmatprep.subr.mxu0 %v4121_v17  ;;  %2417 = vmatprep.subr.mxu1 %v4083_v4 }
 0x61b   :  { %1614 = vmatpush1.msra.mxu0 %v4122_v45  ;;  %1647 = vmatprep.mubr.f32.mxu0 %v4083_v4  ;;  %v4130_v45 = vld [vmem:[#allocation18_spill] sm:$0xff] }
 0x61c   :  { %2418 = vmatpush3.msra.mxu1 %v4123_v44  ;;  %2419 = vmatprep.mubr.msk.f32.mxu1 %vm2599_vm1, %v4083_v4  ;;  %v4131_v44 = vld [vmem:[#allocation30_spill] sm:$0xff] }
 0x61d   :  { %2422 = vmatprep.subr.mxu0 %v1779_v46 }
 0x6bc   :  { %v1478_v61 = vpop.f32.mrf.mxu0  ;;  %v1549_v47 = vpop.f32.mrf.mxu1 }
 0x6bd   :  { %v1553_v48 = vadd.f32 %v1478_v61, %v4124_v5  ;;  %v1567_v62 = vadd.f32 %v3921_v53, %v1549_v47 }
 0x6be   :  { %v2386_v15 = vpop.f32.mrf.mxu1  ;;  %v1480_v2 = vpop.f32.mrf.mxu0 }
 0x6bf   :  { %v1949_v49 = vmul.f32 -1.442695, %v1553_v48  ;;  %v1554_v18 = vadd.f32 %v1480_v2, %v4125_v50  ;;  %v1955_v48 = vld [vmem:[%s4033_s6] ss:$0 sm:$0xff] }
 0x6c1   :  { %2528 = vpow2.f32 %v1949_v49  ;;  %v1950_v51 = vmul.f32 -1.442695, %v1554_v18 }
 0x6c3   :  { %2530 = vpow2.f32 %v1950_v51 }
 0x6ce   :  { %v2529_v11 = vpop.eup %2528 }
 0x6cf   :  { %v1561_v52 = vadd.f32 1.0, %v2529_v11 }
 0x6d0   :  { %v2531_v4 = vpop.eup %2530 }
 0x6d1   :  { %2532 = vrcp.f32 %v1561_v52  ;;  %v1562_v23 = vadd.f32 1.0, %v2531_v4 }
 0x6d3   :  { %2534 = vrcp.f32 %v1562_v23  ;;  %v4132_v23 = vld [vmem:[#allocation14_spill] sm:$0xff] }
 0x6de   :  { %v2533_v54 = vpop.eup %2532 }
 0x6df   :  { %v1568_v12 = vmul.f32 %v2533_v54, %v1567_v62 }
 0x6e0   :  { %v2535_v56 = vpop.eup %2534 }
 0x6e1   :  { %v1569_v20 = vadd.f32 %v1568_v12, %v4126_v55  ;;  %v1571_v1 = vsub.f32 1.0, %v2535_v56  ;;  %v1573_v58 = vmul.f32 %v2535_v56, %v3840_v37 }
 0x6e3   :  { %2536 = vtanh.f32 %v1569_v20 }
 0x6f0   :  { %v2537_v57 = vpop.eup %2536 }
 0x6f1   :  { %v1572_v25 = vmul.f32 %v2537_v57, %v1571_v1 }
 0x6f3   :  { %v3929_v59 = vadd.f32 %v1573_v58, %v1572_v25 }
 0x6f5   :  { %1951 = vst [vmem:[%s4031_s7 + $0x30] sm:$0xff] %v3929_v59  ;;  %1648 = vmatmul.mubr.f32.vlgmr.msra.gmra.mxu0 %v3929_v59  ;;  %2420 = vmatmul.mubr.f32.vlgmr.msra.gmra.mxu1 %v3929_v59  ;;  %v1762_v30 = vmax.f32 %v3929_v59, 0.0 }
 0x6f6   :  { %2423 = vmatpush3.msra.mxu0 %v1779_v46  ;;  %2454 = vmatprep.mubr.f32.mxu0 %v1756_v60  ;;  %v195_v46 = vadd.f32 %v4131_v44, %v4130_v45 }
 0x6f7   :  { %2424 = vmatprep.subr.mxu0 %v1778_v27 }
 0x6f8   :  { %2425 = vmatpush3.msra.mxu0 %v1778_v27 }
 0x6f9   :  { %2426 = vmatprep.subr.mxu0 %v1777_v3 }
 0x6fa   :  { %2427 = vmatpush3.msra.mxu0 %v1777_v3 }
 0x6fb   :  { %2428 = vmatprep.subr.mxu0 %v1776_v42 }
 0x6fc   :  { %2429 = vmatpush3.msra.mxu0 %v1776_v42 }
 0x6fd   :  { %2430 = vmatprep.subr.mxu0 %v1775_v43 }
 0x6fe   :  { %2431 = vmatpush3.msra.mxu0 %v1775_v43 }
 0x6ff   :  { %2432 = vmatprep.subr.mxu0 %v1774_v63 }
 0x700   :  { %2433 = vmatpush3.msra.mxu0 %v1774_v63 }
 0x701   :  { %2434 = vmatprep.subr.mxu0 %v1773_v6 }
 0x702   :  { %2435 = vmatpush3.msra.mxu0 %v1773_v6 }
 0x703   :  { %2436 = vmatprep.subr.mxu0 %v1772_v7 }
 0x704   :  { %2437 = vmatpush3.msra.mxu0 %v1772_v7 }
 0x705   :  { %2438 = vmatprep.subr.mxu0 %v1771_v8 }
 0x706   :  { %2439 = vmatpush3.msra.mxu0 %v1771_v8 }
 0x707   :  { %2440 = vmatprep.subr.mxu0 %v1770_v13 }
 0x708   :  { %2441 = vmatpush3.msra.mxu0 %v1770_v13 }
 0x709   :  { %2442 = vmatprep.subr.mxu0 %v1769_v14 }
 0x70a   :  { %2443 = vmatpush3.msra.mxu0 %v1769_v14 }
 0x70b   :  { %2444 = vmatprep.subr.mxu0 %v1768_v16 }
 0x70c   :  { %2445 = vmatpush3.msra.mxu0 %v1768_v16 }
 0x70d   :  { %2446 = vmatprep.subr.mxu0 %v1767_v19 }
 0x70e   :  { %2447 = vmatpush3.msra.mxu0 %v1767_v19 }
 0x70f   :  { %2448 = vmatprep.subr.mxu0 %v1766_v22 }
 0x710   :  { %2449 = vmatpush3.msra.mxu0 %v1766_v22 }
 0x711   :  { %2450 = vmatprep.subr.mxu0 %v1765_v24 }
 0x712   :  { %2451 = vmatpush3.msra.mxu0 %v1765_v24 }
 0x713   :  { %2452 = vmatprep.subr.mxu0 %v1764_v26 }
 0x714   :  { %2453 = vmatpush3.msra.mxu0 %v1764_v26 }
 0x715   :  { %2455 = vmatmul.mubr.f32.vlgmr.msra.gmra.mxu0 %v1757_v28 }
 0x716   :  { %2457 = vmatprep.mubr.f32.mxu0 %v1758_v31 }
 0x719   :  { %2458 = vmatmul.mubr.f32.gmra.mxu0 %v1759_v39 }
 0x71a   :  { %2460 = vmatprep.mubr.f32.mxu0 %v1760_v40 }
 0x71d   :  { %2461 = vmatmul.mubr.f32.gmra.mxu0 %v1761_v10 }
 0x71e   :  { %2463 = vmatprep.mubr.f32.mxu0 %v1762_v30 }
 0x7b5   :  { %v1649_v32 = vpop.f32.mrf.mxu0  ;;  %v1720_v33 = vpop.f32.mrf.mxu1 }
 0x7b6   :  { %v1724_v35 = vadd.f32 %v1649_v32, %v4129_v34  ;;  %v1738_v2 = vadd.f32 %v3921_v53, %v1720_v33 }
 0x7b7   :  { %v2421_v36 = vpop.f32.mrf.mxu1  ;;  %v1651_v17 = vpop.f32.mrf.mxu0 }
 0x7b8   :  { %v1952_v0 = vmul.f32 -1.442695, %v1724_v35  ;;  %v1725_v41 = vadd.f32 %v1651_v17, %v195_v46 }
 0x7ba   :  { %2538 = vpow2.f32 %v1952_v0  ;;  %v1953_v61 = vmul.f32 -1.442695, %v1725_v41 }
 0x7bc   :  { %2540 = vpow2.f32 %v1953_v61 }
 0x7c7   :  { %v2539_v47 = vpop.eup %2538 }
 0x7c8   :  { %v1732_v37 = vadd.f32 1.0, %v2539_v47 }
 0x7c9   :  { %v2541_v5 = vpop.eup %2540 }
 0x7ca   :  { %2542 = vrcp.f32 %v1732_v37  ;;  %v1733_v15 = vadd.f32 1.0, %v2541_v5 }
 0x7cc   :  { %2544 = vrcp.f32 %v1733_v15 }
 0x7d5   :  { %v2456_v49 = vpop.f32.mrf.mxu0 }
 0x7d6   :  { %v1859_v50 = vadd.f32 %v2456_v49, %v1955_v48 }
 0x7d7   :  { %v2543_v18 = vpop.eup %2542  ;;  %v1853_v51 = vpop.f32.mrf.mxu0 }
 0x7d8   :  { %v1739_v11 = vmul.f32 %v2543_v18, %v1738_v2  ;;  %1893 = vst [vmem:[%s4034_s8 + $0x8] sm:$0xff] %v1859_v50  ;;  %v1854_v52 = vadd.f32 %v1955_v48, %v1853_v51 }
 0x7d9   :  { %v2459_v4 = vpop.f32.mrf.mxu0  ;;  %v2545_v57 = vpop.eup %2544 }
 0x7da   :  { %v1740_v62 = vadd.f32 %v1739_v11, %v4132_v23  ;;  %1892 = vst [vmem:[%s4034_s8] sm:$0xff] %v1854_v52  ;;  %v1869_v54 = vadd.f32 %v2459_v4, %v1955_v48  ;;  %v1742_v25 = vsub.f32 1.0, %v2545_v57  ;;  %v1744_v27 = vmul.f32 %v2545_v57, %v3929_v59 }
 0x7db   :  { %v1863_v12 = vpop.f32.mrf.mxu0 }
 0x7dc   :  { %2546 = vtanh.f32 %v1740_v62  ;;  %1895 = vst [vmem:[%s4034_s8 + $0x18] sm:$0xff] %v1869_v54  ;;  %v1864_v53 = vadd.f32 %v1955_v48, %v1863_v12 }
 0x7dd   :  { %v2462_v55 = vpop.f32.mrf.mxu0 }
 0x7de   :  { %1894 = vst [vmem:[%s4034_s8 + $0x10] sm:$0xff] %v1864_v53  ;;  %v1879_v20 = vadd.f32 %v2462_v55, %v1955_v48 }
 0x7df   :  { %v1873_v56 = vpop.f32.mrf.mxu0 }
 0x7e0   :  { %1897 = vst [vmem:[%s4034_s8 + $0x28] sm:$0xff] %v1879_v20  ;;  %v1874_v1 = vadd.f32 %v1955_v48, %v1873_v56 }
 0x7e2   :  { %1896 = vst [vmem:[%s4034_s8 + $0x20] sm:$0xff] %v1874_v1 }
 0x7e9   :  { %v2547_v58 = vpop.eup %2546 }
 0x7ea   :  { %v1743_v21 = vmul.f32 %v2547_v58, %v1742_v25 }
 0x7ec   :  { %v1745_v60 = vadd.f32 %v1744_v27, %v1743_v21 }
 0x7ee   :  { %1954 = vst [vmem:[%s4031_s7 + $0x38] sm:$0xff] %v1745_v60  ;;  %v1763_v3 = vmax.f32 %v1745_v60, 0.0 }
 0x7f0   :  { %2464 = vmatmul.mubr.f32.gmra.mxu0 %v1763_v3 }
 0x8b0   :  { %v2465_v42 = vpop.f32.mrf.mxu0 }
 0x8b1   :  { %v1889_v43 = vadd.f32 %v2465_v42, %v1955_v48 }
 0x8b2   :  { %v1883_v63 = vpop.f32.mrf.mxu0 }
 0x8b3   :  { %1899 = vst [vmem:[%s4034_s8 + $0x38] sm:$0xff] %v1889_v43  ;;  %v1884_v6 = vadd.f32 %v1955_v48, %v1883_v63 }
 0x8b5   :  { %1898 = vst [vmem:[%s4034_s8 + $0x30] sm:$0xff] %v1884_v6 }

</bundles_post_ra>
